<compile_context>
chip_gen: v7x
topology: tpu7x:2x2x1
jax: 0.10.0
libtpu: 0.0.40
codegen_flags: <defaults>
</compile_context>

<pallas_src>
import jax
import jax.numpy as jnp
from jax.experimental import pallas as pl
from jax.experimental.pallas import tpu as pltpu

IN_FEATURES = 205
HIDDEN = 1024
OUT_FEATURES = 4

K_PAD = 256    # 205 padded to a lane/MXU-friendly multiple of 128
N_PAD = 128    # decoder output padded to one full lane width


def _cdiv(a, m):
    return -(-a // m)


def _round_up(n, m):
    return _cdiv(n, m) * m


def _net_kernel(x_ref, w1_ref, b1_ref, w2_ref, b2_ref, enc_ref, dec_ref):
    cdt = w1_ref.dtype                       # MXU input dtype (f32 or bf16)
    x = x_ref[...].astype(cdt)
    # encode = relu(x @ W1 + b1)   (f32 MXU accumulation)
    h = jnp.dot(x, w1_ref[...], preferred_element_type=jnp.float32) + b1_ref[...]
    enc = jnp.maximum(h, 0.0)
    enc_ref[...] = enc.astype(enc_ref.dtype)
    # decode = encode @ W2 + b2   (consumes the in-register activation)
    dec = (jnp.dot(enc.astype(w2_ref.dtype), w2_ref[...],
                   preferred_element_type=jnp.float32) + b2_ref[...])
    dec_ref[...] = dec.astype(dec_ref.dtype)


def prepare_params(w1, b1, w2, b2, *, dtype=jnp.float32):
    """One-time padding / casting of the Linear parameters.

    w1: (205, 1024), b1: (1024,), w2: (1024, 4), b2: (4,)  -- (in, out) layout.
    Returns (W1 (256,1024), b1 (1,1024) f32, W2 (1024,128), b2 (1,128) f32).
    Padding is zero so it contributes nothing to any dot product.
    """
    w1_p = jnp.pad(w1.astype(dtype), ((0, K_PAD - IN_FEATURES), (0, 0)))
    b1_p = b1.reshape(1, HIDDEN).astype(jnp.float32)
    w2_p = jnp.pad(w2.astype(dtype), ((0, 0), (0, N_PAD - OUT_FEATURES)))
    b2_p = jnp.pad(b2.astype(jnp.float32), (0, N_PAD - OUT_FEATURES)).reshape(1, N_PAD)
    return w1_p, b1_p, w2_p, b2_p


def net_forward(x, w1_p, b1_p, w2_p, b2_p, *, block_b=1024):
    """x: (B, 205) f32; padded params from prepare_params.

    Returns (encode (B, 1024) f32, decode (B, 4) f32) -- identical semantics
    to the PyTorch Net.forward.
    """
    B = x.shape[0]
    B8 = _round_up(B, 8)

    # Adaptive batch tile: >= min(4, B8/8) grid steps (megacore + pipelining),
    # tile capped at block_b, padding waste bounded by num_tiles * 8 rows.
    max_tb = max(8, _round_up(block_b, 8))
    min_tiles = min(4, _cdiv(B8, 8))
    num_tiles = max(_cdiv(B8, max_tb), min_tiles)
    TB = _round_up(_cdiv(B8, num_tiles), 8)
    B_pad = num_tiles * TB

    # Only x is padded per call (zeros -> zero contribution to every dot).
    x_p = jnp.pad(x, ((0, B_pad - B), (0, K_PAD - IN_FEATURES)))

    tiled = lambda shape: pl.BlockSpec(shape, lambda i: (i, 0))      # per-batch-tile
    resident = lambda shape: pl.BlockSpec(                            # VMEM-resident,
        shape, lambda i: (0, 0), pipeline_mode=pl.Buffered(1))        # single-buffered

    enc_p, dec_p = pl.pallas_call(
        _net_kernel,
        out_shape=(
            jax.ShapeDtypeStruct((B_pad, HIDDEN), jnp.float32),
            jax.ShapeDtypeStruct((B_pad, N_PAD), jnp.float32),
        ),
        grid=(num_tiles,),
        in_specs=[
            tiled((TB, K_PAD)),          # x tile
            resident((K_PAD, HIDDEN)),   # W1 (resident)
            resident((1, HIDDEN)),       # b1 (resident)
            resident((HIDDEN, N_PAD)),   # W2 (resident)
            resident((1, N_PAD)),        # b2 (resident)
        ],
        out_specs=(
            tiled((TB, HIDDEN)),         # encode tile (lane-dense, unmasked vst)
            tiled((TB, N_PAD)),          # decode tile (padded to 128 lanes)
        ),
        compiler_params=pltpu.CompilerParams(
            dimension_semantics=("parallel",),
            vmem_limit_bytes=32 * 1024 * 1024,
        ),
    )(x_p, w1_p, b1_p, w2_p, b2_p)

    # Strip batch / lane padding back to the module's true output shapes.
    return enc_p[:B], dec_p[:B, :OUT_FEATURES]


def init_params(key):
    """PyTorch nn.Linear default init (uniform +-1/sqrt(fan_in)), stored as
    (in_features, out_features) so the kernel computes y = x @ W + b."""
    k1, k2, k3, k4 = jax.random.split(key, 4)
    bound1 = 1.0 / jnp.sqrt(IN_FEATURES)
    bound2 = 1.0 / jnp.sqrt(HIDDEN)
    w1 = jax.random.uniform(k1, (IN_FEATURES, HIDDEN), jnp.float32, -bound1, bound1)
    b1 = jax.random.uniform(k2, (HIDDEN,), jnp.float32, -bound1, bound1)
    w2 = jax.random.uniform(k3, (HIDDEN, OUT_FEATURES), jnp.float32, -bound2, bound2)
    b2 = jax.random.uniform(k4, (OUT_FEATURES,), jnp.float32, -bound2, bound2)
    return w1, b1, w2, b2


if __name__ == "__main__":
    key = jax.random.PRNGKey(0)
    kx, kp = jax.random.split(key)

    B = 8
    x = jax.random.normal(kx, (B, IN_FEATURES), dtype=jnp.float32)
    w1, b1, w2, b2 = init_params(kp)

    # One-time parameter prep (hoisted out of the per-call hot path).
    params_f32 = prepare_params(w1, b1, w2, b2)
    fwd = jax.jit(net_forward)

    enc, dec = fwd(x, *params_f32)
    jax.block_until_ready((enc, dec))

    # Reference check in plain JAX (f32).
    enc_ref = jnp.maximum(x @ w1 + b1, 0.0)
    dec_ref = enc_ref @ w2 + b2
    assert enc.shape == (B, HIDDEN) and dec.shape == (B, OUT_FEATURES)
    assert jnp.allclose(enc, enc_ref, atol=1e-4, rtol=1e-4)
    assert jnp.allclose(dec, dec_ref, atol=1e-4, rtol=1e-4)

    # Batch that is not a multiple of 8 / the tile size (adaptive TB, 4 tiles).
    B2 = 300
    x2 = jax.random.normal(kx, (B2, IN_FEATURES), dtype=jnp.float32)
    enc2, dec2 = fwd(x2, *params_f32)
    jax.block_until_ready((enc2, dec2))
    enc2_ref = jnp.maximum(x2 @ w1 + b1, 0.0)
    dec2_ref = enc2_ref @ w2 + b2
    assert jnp.allclose(enc2, enc2_ref, atol=1e-4, rtol=1e-4)
    assert jnp.allclose(dec2, dec2_ref, atol=1e-4, rtol=1e-4)

    # Optional bf16 fast path (native MXU rate, f32 accumulation) -- looser
    # tolerance, gate on downstream accuracy requirements.
    params_bf16 = prepare_params(w1, b1, w2, b2, dtype=jnp.bfloat16)
    enc3, dec3 = fwd(x, *params_bf16)
    jax.block_until_ready((enc3, dec3))
    assert jnp.allclose(enc3, enc_ref, atol=5e-2, rtol=5e-2)
    assert jnp.allclose(dec3, dec_ref, atol=5e-2, rtol=5e-2)

    print("KERNEL_OK")
</pallas_src>

<mosaic_0001>
module attributes {stable_mosaic.version = 11 : i64} {
  func.func @_net_kernel(%arg0: i32, %arg1: memref<8x256xf32, #tpu.memory_space<vmem>>, %arg2: memref<256x1024xf32, #tpu.memory_space<vmem>>, %arg3: memref<1x1024xf32, #tpu.memory_space<vmem>>, %arg4: memref<1024x128xf32, #tpu.memory_space<vmem>>, %arg5: memref<1x128xf32, #tpu.memory_space<vmem>>, %arg6: memref<8x1024xf32, #tpu.memory_space<vmem>>, %arg7: memref<8x128xf32, #tpu.memory_space<vmem>>) attributes {dimension_semantics = [#tpu.dimension_semantics<parallel>], iteration_bounds = array<i64: 1>, scalar_prefetch = 0 : i64, scratch_operands = 0 : i64, tpu.core_type = #tpu.core_type<tc>, window_params = [{transform_indices = @transform_0, window_bounds = array<i64: 8, 256>}, {pipeline_mode = #tpu.pipeline_mode<synchronous>, transform_indices = @transform_1, window_bounds = array<i64: 256, 1024>}, {pipeline_mode = #tpu.pipeline_mode<synchronous>, transform_indices = @transform_2, window_bounds = array<i64: 1, 1024>}, {pipeline_mode = #tpu.pipeline_mode<synchronous>, transform_indices = @transform_3, window_bounds = array<i64: 1024, 128>}, {pipeline_mode = #tpu.pipeline_mode<synchronous>, transform_indices = @transform_4, window_bounds = array<i64: 1, 128>}, {transform_indices = @transform_5, window_bounds = array<i64: 8, 1024>}, {transform_indices = @transform_6, window_bounds = array<i64: 8, 128>}]} {
    %c0 = arith.constant 0 : index
    %c0_0 = arith.constant 0 : index
    %0 = vector.load %arg1[%c0, %c0_0] : memref<8x256xf32, #tpu.memory_space<vmem>>, vector<8x256xf32>
    %c0_1 = arith.constant 0 : index
    %c0_2 = arith.constant 0 : index
    %1 = vector.load %arg2[%c0_1, %c0_2] : memref<256x1024xf32, #tpu.memory_space<vmem>>, vector<256x1024xf32>
    %cst = arith.constant dense<0.000000e+00> : vector<8x1024xf32>
    %2 = tpu.matmul %0, %1, %cst {dimension_numbers = #tpu.dot_dimension_numbers<[1], [0], [0], [1], [0, 0, 1, 1], [], []>} : vector<8x256xf32>, vector<256x1024xf32>, vector<8x1024xf32> -> vector<8x1024xf32>
    %c0_3 = arith.constant 0 : index
    %c0_4 = arith.constant 0 : index
    %3 = vector.load %arg3[%c0_3, %c0_4] : memref<1x1024xf32, #tpu.memory_space<vmem>>, vector<1x1024xf32>
    %4 = vector.broadcast %3 : vector<1x1024xf32> to vector<8x1024xf32>
    %5 = arith.addf %2, %4 : vector<8x1024xf32>
    %cst_5 = arith.constant 0.000000e+00 : f32
    %6 = vector.broadcast %cst_5 : f32 to vector<8x1024xf32>
    %7 = arith.maximumf %5, %6 : vector<8x1024xf32>
    %c0_6 = arith.constant 0 : index
    %c0_7 = arith.constant 0 : index
    %8 = vector.load %arg6[%c0_6, %c0_7] : memref<8x1024xf32, #tpu.memory_space<vmem>>, vector<8x1024xf32>
    tpu.vector_store %arg6[%c0_6, %c0_7], %7 {strides = array<i32>} : memref<8x1024xf32, #tpu.memory_space<vmem>>, vector<8x1024xf32>,
    %c0_8 = arith.constant 0 : index
    %c0_9 = arith.constant 0 : index
    %9 = vector.load %arg4[%c0_8, %c0_9] : memref<1024x128xf32, #tpu.memory_space<vmem>>, vector<1024x128xf32>
    %cst_10 = arith.constant dense<0.000000e+00> : vector<8x128xf32>
    %10 = tpu.matmul %7, %9, %cst_10 {dimension_numbers = #tpu.dot_dimension_numbers<[1], [0], [0], [1], [0, 0, 1, 1], [], []>} : vector<8x1024xf32>, vector<1024x128xf32>, vector<8x128xf32> -> vector<8x128xf32>
    %c0_11 = arith.constant 0 : index
    %c0_12 = arith.constant 0 : index
    %11 = vector.load %arg5[%c0_11, %c0_12] : memref<1x128xf32, #tpu.memory_space<vmem>>, vector<1x128xf32>
    %12 = vector.broadcast %11 : vector<1x128xf32> to vector<8x128xf32>
    %13 = arith.addf %10, %12 : vector<8x128xf32>
    %c0_13 = arith.constant 0 : index
    %c0_14 = arith.constant 0 : index
    %14 = vector.load %arg7[%c0_13, %c0_14] : memref<8x128xf32, #tpu.memory_space<vmem>>, vector<8x128xf32>
    tpu.vector_store %arg7[%c0_13, %c0_14], %13 {strides = array<i32>} : memref<8x128xf32, #tpu.memory_space<vmem>>, vector<8x128xf32>,
    return
  }
  func.func @transform_0(%arg0: i32) -> (i32, i32) {
    %c0_i32 = arith.constant 0 : i32
    %c0_i32_0 = arith.constant 0 : i32
    return %arg0, %c0_i32 : i32, i32
  }
  func.func @transform_1(%arg0: i32) -> (i32, i32) {
    %c0_i32 = arith.constant 0 : i32
    %c0_i32_0 = arith.constant 0 : i32
    %c0_i32_1 = arith.constant 0 : i32
    return %c0_i32, %c0_i32_0 : i32, i32
  }
  func.func @transform_2(%arg0: i32) -> (i32, i32) {
    %c0_i32 = arith.constant 0 : i32
    %c0_i32_0 = arith.constant 0 : i32
    %c0_i32_1 = arith.constant 0 : i32
    return %c0_i32, %c0_i32_0 : i32, i32
  }
  func.func @transform_3(%arg0: i32) -> (i32, i32) {
    %c0_i32 = arith.constant 0 : i32
    %c0_i32_0 = arith.constant 0 : i32
    %c0_i32_1 = arith.constant 0 : i32
    return %c0_i32, %c0_i32_0 : i32, i32
  }
  func.func @transform_4(%arg0: i32) -> (i32, i32) {
    %c0_i32 = arith.constant 0 : i32
    %c0_i32_0 = arith.constant 0 : i32
    %c0_i32_1 = arith.constant 0 : i32
    return %c0_i32, %c0_i32_0 : i32, i32
  }
  func.func @transform_5(%arg0: i32) -> (i32, i32) {
    %c0_i32 = arith.constant 0 : i32
    %c0_i32_0 = arith.constant 0 : i32
    return %arg0, %c0_i32 : i32, i32
  }
  func.func @transform_6(%arg0: i32) -> (i32, i32) {
    %c0_i32 = arith.constant 0 : i32
    %c0_i32_0 = arith.constant 0 : i32
    return %arg0, %c0_i32 : i32, i32
  }
}

</mosaic_0001>

<bundles_post_ra>
// kernel: net_forward.1
= control target key start
LH: loop header
LB: loop body
LE: loop exit
PB: predicated region body
PF: predicated region fallthrough
CT: control target
= control target key end

     0   :  { %12 = vsyncpa [#allocation3], 0  ;;  %s1816_s0 = inlined_call_operand.vmem [shape: f32[8,256], index: 0, kind: input, shape index: {}]   ;;  %s1817_s1 = inlined_call_operand.hbm [shape: f32[256,1024], index: 1, kind: input, shape index: {}]   ;;  %s1818_s2 = inlined_call_operand.vmem [shape: f32[1,1024], index: 2, kind: input, shape index: {}]   ;;  %s1819_s3 = inlined_call_operand.hbm [shape: f32[1024,128], index: 3, kind: input, shape index: {}]   ;;  %s1820_s4 = inlined_call_operand.vmem [shape: f32[1,128], index: 4, kind: input, shape index: {}]   ;;  %s1821_s5 = inlined_call_operand.hbm [shape: f32[8,1024], index: 5, kind: output, shape index: {0}]   ;;  %s1822_s6 = inlined_call_operand.vmem [shape: f32[8,128], index: 6, kind: output, shape index: {1}]  }
   0x1   :  { %13 = vsyncpa [#allocation6], 0 }
   0x2   :  { %14 = vsyncpa [#allocation4], 0  ;;  %s1691_s21 = smov [#allocation2]   ;;  %s1619_s25 = scalar_lea.hbm %s1817_s1, 32768 }
   0x3   :  { %s22_s22 = sshll.u32 %s1691_s21, 4  ;;  %p1620_p0 = scmp.ne.s32.totalorder %s1817_s1, %s1619_s25  ;;  %s23_s22 = int_to_ptr.vmem [resolvable:$true] %s22_s22 }
   0x4   :  { %p1623_p1 = scmp.lt.u32.totalorder %s1619_s25, %s1817_s1 }
   0x6   :  { %p1625_p2 = pnand %p1623_p1, %p1620_p0 }
   0x8   :  { %1628 = shalt.err (!%p1625_p2)
}
   0x9   :  { %s1629_s30 = scalar_lea.vmem %s23_s22, 32768  ;;  %p1634_p4 = scmp.lt.s32.totalorder %s23_s22, %s23_s22 }
   0xa   :  { %p1630_p3 = scmp.ne.s32.totalorder %s23_s22, %s1629_s30  ;;  %p1635_p5 = scmp.lt.s32.totalorder %s1629_s30, %s1629_s30 }
   0xc   :  { %p1636_p6 = por %p1635_p5, %p1634_p4 }
   0xe   :  { %p1637_p7 = pnand %p1636_p6, %p1630_p3 }
  0x10   :  { %1640 = shalt.err (!%p1637_p7)
}
  0x11   :  { %s1692_s7 = smov 1024   ;;  %s1693_s8 = smov 64  }
  0x12   :  { %28 = dma.hbm_to_vmem [thread:$0]  %s1817_s1, 32768, %s23_s22, [#allocation3], %s1692_s7, %s1692_s7, %s1693_s8  }
  0x13   :  { %s1694_s11 = smov [#allocation5]   ;;  %s1641_s15 = scalar_lea.hbm %s1819_s3, 16384 }
  0x14   :  { %s36_s12 = sshll.u32 %s1694_s11, 4  ;;  %p1642_p8 = scmp.ne.s32.totalorder %s1819_s3, %s1641_s15  ;;  %s37_s12 = int_to_ptr.vmem [resolvable:$true] %s36_s12 }
  0x15   :  { %p1645_p9 = scmp.lt.u32.totalorder %s1641_s15, %s1819_s3 }
  0x17   :  { %p1647_p10 = pnand %p1645_p9, %p1642_p8 }
  0x19   :  { %1650 = shalt.err (!%p1647_p10)
}
  0x1a   :  { %s1651_s20 = scalar_lea.vmem %s37_s12, 16384  ;;  %p1656_p12 = scmp.lt.s32.totalorder %s37_s12, %s37_s12 }
  0x1b   :  { %p1652_p11 = scmp.ne.s32.totalorder %s37_s12, %s1651_s20  ;;  %p1657_p13 = scmp.lt.s32.totalorder %s1651_s20, %s1651_s20 }
  0x1d   :  { %p1658_p0 = por %p1657_p13, %p1656_p12 }
  0x1f   :  { %p1659_p1 = pnand %p1658_p0, %p1652_p11 }
  0x21   :  { %1662 = shalt.err (!%p1659_p1)
}
  0x22   :  { %s1695_s1 = smov 128   ;;  %s1696_s21 = smov 8  }
  0x23   :  { %42 = dma.hbm_to_vmem [thread:$0]  %s1819_s3, 16384, %s37_s12, [#allocation6], %s1695_s1, %s1695_s1, %s1696_s21  }
  0x24   :  { %1685 = dma.done.wait [#allocation3], 32768  }
  0x25   :  { %1686 = vsyncadd [#allocation3], 4294934528 }
  0x26   :  { %1687 = dma.done.wait [#allocation6], 16384  }
  0x27   :  { %1688 = vsyncadd [#allocation6], 4294950912  ;;  %v54_v0 = vld [vmem:[#allocation2 + $0x8] sm:$0xff]  ;;  %v56_v2 = vld [vmem:[#allocation2 + $0x18] sm:$0xff] }
  0x28   :  { %v62_v1 = vld [vmem:[#allocation2 + $0x48] sm:$0xff]  ;;  %v64_v4 = vld [vmem:[#allocation2 + $0x58] sm:$0xff]  ;;  %v53_v5 = vld [vmem:[#allocation2] sm:$0xff] }
  0x29   :  { %v1228_v3 = vpack.c.bf16 %v62_v1, %v54_v0  ;;  %v61_v6 = vld [vmem:[#allocation2 + $0x40] sm:$0xff]  ;;  %v1292_v7 = vpack.c.bf16 %v64_v4, %v56_v2  ;;  %v55_v9 = vld [vmem:[#allocation2 + $0x10] sm:$0xff]  ;;  %v70_v11 = vld [vmem:[#allocation2 + $0x88] sm:$0xff] }
  0x2a   :  { %v1230_v8 = vpack.c.bf16 %v61_v6, %v53_v5  ;;  %v63_v10 = vld [vmem:[#allocation2 + $0x50] sm:$0xff]  ;;  %v78_v13 = vld [vmem:[#allocation2 + $0xc8] sm:$0xff]  ;;  %v72_v14 = vld [vmem:[#allocation2 + $0x98] sm:$0xff] }
  0x2b   :  { %1229 = vmatprep.subr.bf16.mxu0 %v1228_v3  ;;  %v1294_v12 = vpack.c.bf16 %v63_v10, %v55_v9  ;;  %v80_v15 = vld [vmem:[#allocation2 + $0xd8] sm:$0xff]  ;;  %1293 = vmatprep.subr.bf16.mxu1 %v1292_v7  ;;  %v1232_v16 = vpack.c.bf16 %v78_v13, %v70_v11  ;;  %v69_v18 = vld [vmem:[#allocation2 + $0x80] sm:$0xff]  ;;  %v71_v20 = vld [vmem:[#allocation2 + $0x90] sm:$0xff] }
  0x2c   :  { %1231 = vmatpush1.bf16.msra.mxu0 %v1230_v8  ;;  %v1296_v17 = vpack.c.bf16 %v80_v15, %v72_v14  ;;  %v77_v19 = vld [vmem:[#allocation2 + $0xc0] sm:$0xff]  ;;  %v79_v22 = vld [vmem:[#allocation2 + $0xd0] sm:$0xff]  ;;  %v86_v23 = vld [vmem:[#allocation2 + $0x108] sm:$0xff] }
  0x2d   :  { %1295 = vmatpush1.bf16.msra.mxu1 %v1294_v12  ;;  %v1234_v21 = vpack.c.bf16 %v77_v19, %v69_v18  ;;  %v94_v24 = vld [vmem:[#allocation2 + $0x148] sm:$0xff]  ;;  %1233 = vmatprep.subr.bf16.mxu0 %v1232_v16  ;;  %v1298_v25 = vpack.c.bf16 %v79_v22, %v71_v20  ;;  %v88_v27 = vld [vmem:[#allocation2 + $0x118] sm:$0xff]  ;;  %v85_v29 = vld [vmem:[#allocation2 + $0x100] sm:$0xff] }
  0x2e   :  { %1297 = vmatprep.subr.bf16.mxu1 %v1296_v17  ;;  %v1236_v26 = vpack.c.bf16 %v94_v24, %v86_v23  ;;  %v96_v28 = vld [vmem:[#allocation2 + $0x158] sm:$0xff]  ;;  %v93_v31 = vld [vmem:[#allocation2 + $0x140] sm:$0xff]  ;;  %v87_v32 = vld [vmem:[#allocation2 + $0x110] sm:$0xff] }
  0x2f   :  { %v1300_v30 = vpack.c.bf16 %v96_v28, %v88_v27  ;;  %v95_v33 = vld [vmem:[#allocation2 + $0x150] sm:$0xff]  ;;  %v1238_v34 = vpack.c.bf16 %v93_v31, %v85_v29  ;;  %v102_v35 = vld [vmem:[#allocation2 + $0x188] sm:$0xff]  ;;  %v104_v37 = vld [vmem:[#allocation2 + $0x198] sm:$0xff] }
  0x30   :  { %1235 = vmatpush1.bf16.msra.mxu0 %v1234_v21  ;;  %v110_v36 = vld [vmem:[#allocation2 + $0x1c8] sm:$0xff]  ;;  %v1302_v38 = vpack.c.bf16 %v95_v33, %v87_v32  ;;  %v112_v40 = vld [vmem:[#allocation2 + $0x1d8] sm:$0xff]  ;;  %v101_v41 = vld [vmem:[#allocation2 + $0x180] sm:$0xff] }
  0x31   :  { %1299 = vmatpush1.bf16.msra.mxu1 %v1298_v25  ;;  %1237 = vmatprep.subr.bf16.mxu0 %v1236_v26  ;;  %v1240_v39 = vpack.c.bf16 %v110_v36, %v102_v35  ;;  %v109_v42 = vld [vmem:[#allocation2 + $0x1c0] sm:$0xff]  ;;  %v1304_v43 = vpack.c.bf16 %v112_v40, %v104_v37  ;;  %v103_v44 = vld [vmem:[#allocation2 + $0x190] sm:$0xff]  ;;  %v118_v46 = vld [vmem:[#allocation2 + $0x208] sm:$0xff] }
  0x32   :  { %1301 = vmatprep.subr.bf16.mxu1 %v1300_v30  ;;  %v111_v45 = vld [vmem:[#allocation2 + $0x1d0] sm:$0xff]  ;;  %v126_v47 = vld [vmem:[#allocation2 + $0x248] sm:$0xff]  ;;  %v120_v48 = vld [vmem:[#allocation2 + $0x218] sm:$0xff]  ;;  %v1242_v50 = vpack.c.bf16 %v109_v42, %v101_v41 }
  0x33   :  { %v128_v49 = vld [vmem:[#allocation2 + $0x258] sm:$0xff]  ;;  %v1306_v51 = vpack.c.bf16 %v111_v45, %v103_v44  ;;  %v1244_v52 = vpack.c.bf16 %v126_v47, %v118_v46  ;;  %v117_v53 = vld [vmem:[#allocation2 + $0x200] sm:$0xff]  ;;  %v119_v55 = vld [vmem:[#allocation2 + $0x210] sm:$0xff] }
  0x34   :  { %1239 = vmatpush1.bf16.msra.mxu0 %v1238_v34  ;;  %v125_v54 = vld [vmem:[#allocation2 + $0x240] sm:$0xff]  ;;  %v1308_v56 = vpack.c.bf16 %v128_v49, %v120_v48  ;;  %v127_v57 = vld [vmem:[#allocation2 + $0x250] sm:$0xff]  ;;  %v134_v58 = vld [vmem:[#allocation2 + $0x288] sm:$0xff] }
  0x35   :  { %1303 = vmatpush1.bf16.msra.mxu1 %v1302_v38  ;;  %1241 = vmatprep.subr.bf16.mxu0 %v1240_v39  ;;  %v142_v59 = vld [vmem:[#allocation2 + $0x2c8] sm:$0xff]  ;;  %v136_v60 = vld [vmem:[#allocation2 + $0x298] sm:$0xff]  ;;  %v1246_v62 = vpack.c.bf16 %v125_v54, %v117_v53  ;;  %v1310_v63 = vpack.c.bf16 %v127_v57, %v119_v55  ;;  %v133_v1 = vld [vmem:[#allocation2 + $0x280] sm:$0xff] }
  0x36   :  { %1305 = vmatprep.subr.bf16.mxu1 %v1304_v43  ;;  %v144_v61 = vld [vmem:[#allocation2 + $0x2d8] sm:$0xff]  ;;  %v1248_v0 = vpack.c.bf16 %v142_v59, %v134_v58  ;;  %v141_v2 = vld [vmem:[#allocation2 + $0x2c0] sm:$0xff]  ;;  %v135_v3 = vld [vmem:[#allocation2 + $0x290] sm:$0xff] }
  0x37   :  { %v1312_v4 = vpack.c.bf16 %v144_v61, %v136_v60  ;;  %v143_v5 = vld [vmem:[#allocation2 + $0x2d0] sm:$0xff]  ;;  %v150_v6 = vld [vmem:[#allocation2 + $0x308] sm:$0xff]  ;;  %v152_v8 = vld [vmem:[#allocation2 + $0x318] sm:$0xff]  ;;  %v1250_v10 = vpack.c.bf16 %v141_v2, %v133_v1 }
  0x38   :  { %1243 = vmatpush1.bf16.msra.mxu0 %v1242_v50  ;;  %v158_v7 = vld [vmem:[#allocation2 + $0x348] sm:$0xff]  ;;  %v160_v9 = vld [vmem:[#allocation2 + $0x358] sm:$0xff]  ;;  %v1314_v11 = vpack.c.bf16 %v143_v5, %v135_v3  ;;  %v149_v13 = vld [vmem:[#allocation2 + $0x300] sm:$0xff] }
  0x39   :  { %1307 = vmatpush1.bf16.msra.mxu1 %v1306_v51  ;;  %1245 = vmatprep.subr.bf16.mxu0 %v1244_v52  ;;  %v1252_v12 = vpack.c.bf16 %v158_v7, %v150_v6  ;;  %v157_v14 = vld [vmem:[#allocation2 + $0x340] sm:$0xff]  ;;  %v151_v15 = vld [vmem:[#allocation2 + $0x310] sm:$0xff]  ;;  %v1316_v16 = vpack.c.bf16 %v160_v9, %v152_v8  ;;  %v166_v18 = vld [vmem:[#allocation2 + $0x388] sm:$0xff] }
  0x3a   :  { %1309 = vmatprep.subr.bf16.mxu1 %v1308_v56  ;;  %v159_v17 = vld [vmem:[#allocation2 + $0x350] sm:$0xff]  ;;  %v174_v19 = vld [vmem:[#allocation2 + $0x3c8] sm:$0xff]  ;;  %v168_v20 = vld [vmem:[#allocation2 + $0x398] sm:$0xff]  ;;  %v1254_v22 = vpack.c.bf16 %v157_v14, %v149_v13 }
  0x3b   :  { %v176_v21 = vld [vmem:[#allocation2 + $0x3d8] sm:$0xff]  ;;  %v1318_v23 = vpack.c.bf16 %v159_v17, %v151_v15  ;;  %v1256_v24 = vpack.c.bf16 %v174_v19, %v166_v18  ;;  %v165_v25 = vld [vmem:[#allocation2 + $0x380] sm:$0xff]  ;;  %v167_v27 = vld [vmem:[#allocation2 + $0x390] sm:$0xff] }
  0x3c   :  { %1247 = vmatpush1.bf16.msra.mxu0 %v1246_v62  ;;  %v173_v26 = vld [vmem:[#allocation2 + $0x3c0] sm:$0xff]  ;;  %v1320_v28 = vpack.c.bf16 %v176_v21, %v168_v20  ;;  %v175_v29 = vld [vmem:[#allocation2 + $0x3d0] sm:$0xff]  ;;  %v182_v30 = vld [vmem:[#allocation2 + $0x408] sm:$0xff] }
  0x3d   :  { %1311 = vmatpush1.bf16.msra.mxu1 %v1310_v63  ;;  %1249 = vmatprep.subr.bf16.mxu0 %v1248_v0  ;;  %v190_v31 = vld [vmem:[#allocation2 + $0x448] sm:$0xff]  ;;  %v184_v32 = vld [vmem:[#allocation2 + $0x418] sm:$0xff]  ;;  %v1258_v34 = vpack.c.bf16 %v173_v26, %v165_v25  ;;  %v1322_v35 = vpack.c.bf16 %v175_v29, %v167_v27  ;;  %v181_v37 = vld [vmem:[#allocation2 + $0x400] sm:$0xff] }
  0x3e   :  { %1313 = vmatprep.subr.bf16.mxu1 %v1312_v4  ;;  %v192_v33 = vld [vmem:[#allocation2 + $0x458] sm:$0xff]  ;;  %v1260_v36 = vpack.c.bf16 %v190_v31, %v182_v30  ;;  %v189_v38 = vld [vmem:[#allocation2 + $0x440] sm:$0xff]  ;;  %v183_v39 = vld [vmem:[#allocation2 + $0x410] sm:$0xff] }
  0x3f   :  { %v1324_v40 = vpack.c.bf16 %v192_v33, %v184_v32  ;;  %v191_v41 = vld [vmem:[#allocation2 + $0x450] sm:$0xff]  ;;  %v198_v42 = vld [vmem:[#allocation2 + $0x488] sm:$0xff]  ;;  %v200_v44 = vld [vmem:[#allocation2 + $0x498] sm:$0xff]  ;;  %v1262_v46 = vpack.c.bf16 %v189_v38, %v181_v37 }
  0x40   :  { %1251 = vmatpush1.bf16.msra.mxu0 %v1250_v10  ;;  %v206_v43 = vld [vmem:[#allocation2 + $0x4c8] sm:$0xff]  ;;  %v208_v45 = vld [vmem:[#allocation2 + $0x4d8] sm:$0xff]  ;;  %v1326_v47 = vpack.c.bf16 %v191_v41, %v183_v39  ;;  %v197_v49 = vld [vmem:[#allocation2 + $0x480] sm:$0xff] }
  0x41   :  { %1315 = vmatpush1.bf16.msra.mxu1 %v1314_v11  ;;  %1253 = vmatprep.subr.bf16.mxu0 %v1252_v12  ;;  %v1264_v48 = vpack.c.bf16 %v206_v43, %v198_v42  ;;  %v205_v50 = vld [vmem:[#allocation2 + $0x4c0] sm:$0xff]  ;;  %v199_v51 = vld [vmem:[#allocation2 + $0x490] sm:$0xff]  ;;  %v1328_v52 = vpack.c.bf16 %v208_v45, %v200_v44  ;;  %v214_v54 = vld [vmem:[#allocation2 + $0x508] sm:$0xff] }
  0x42   :  { %1317 = vmatprep.subr.bf16.mxu1 %v1316_v16  ;;  %v207_v53 = vld [vmem:[#allocation2 + $0x4d0] sm:$0xff]  ;;  %v222_v55 = vld [vmem:[#allocation2 + $0x548] sm:$0xff]  ;;  %v216_v56 = vld [vmem:[#allocation2 + $0x518] sm:$0xff]  ;;  %v1266_v58 = vpack.c.bf16 %v205_v50, %v197_v49 }
  0x43   :  { %v224_v57 = vld [vmem:[#allocation2 + $0x558] sm:$0xff]  ;;  %v1330_v59 = vpack.c.bf16 %v207_v53, %v199_v51  ;;  %v1268_v60 = vpack.c.bf16 %v222_v55, %v214_v54  ;;  %v213_v61 = vld [vmem:[#allocation2 + $0x500] sm:$0xff]  ;;  %v215_v63 = vld [vmem:[#allocation2 + $0x510] sm:$0xff] }
  0x44   :  { %1255 = vmatpush1.bf16.msra.mxu0 %v1254_v22  ;;  %v221_v62 = vld [vmem:[#allocation2 + $0x540] sm:$0xff]  ;;  %v1332_v0 = vpack.c.bf16 %v224_v57, %v216_v56  ;;  %v223_v1 = vld [vmem:[#allocation2 + $0x550] sm:$0xff]  ;;  %v230_v2 = vld [vmem:[#allocation2 + $0x588] sm:$0xff] }
  0x45   :  { %1319 = vmatpush1.bf16.msra.mxu1 %v1318_v23  ;;  %1257 = vmatprep.subr.bf16.mxu0 %v1256_v24  ;;  %v238_v3 = vld [vmem:[#allocation2 + $0x5c8] sm:$0xff]  ;;  %v232_v4 = vld [vmem:[#allocation2 + $0x598] sm:$0xff]  ;;  %v1270_v6 = vpack.c.bf16 %v221_v62, %v213_v61  ;;  %v229_v7 = vld [vmem:[#allocation2 + $0x580] sm:$0xff]  ;;  %v1334_v8 = vpack.c.bf16 %v223_v1, %v215_v63 }
  0x46   :  { %1321 = vmatprep.subr.bf16.mxu1 %v1320_v28  ;;  %v240_v5 = vld [vmem:[#allocation2 + $0x5d8] sm:$0xff]  ;;  %v1272_v9 = vpack.c.bf16 %v238_v3, %v230_v2  ;;  %v237_v10 = vld [vmem:[#allocation2 + $0x5c0] sm:$0xff]  ;;  %v231_v11 = vld [vmem:[#allocation2 + $0x590] sm:$0xff] }
  0x47   :  { %v239_v12 = vld [vmem:[#allocation2 + $0x5d0] sm:$0xff]  ;;  %v1336_v13 = vpack.c.bf16 %v240_v5, %v232_v4  ;;  %v246_v14 = vld [vmem:[#allocation2 + $0x608] sm:$0xff]  ;;  %v248_v17 = vld [vmem:[#allocation2 + $0x618] sm:$0xff]  ;;  %v1274_v19 = vpack.c.bf16 %v237_v10, %v229_v7 }
  0x48   :  { %1259 = vmatpush1.bf16.msra.mxu0 %v1258_v34  ;;  %v254_v15 = vld [vmem:[#allocation2 + $0x648] sm:$0xff]  ;;  %v256_v18 = vld [vmem:[#allocation2 + $0x658] sm:$0xff]  ;;  %v1338_v20 = vpack.c.bf16 %v239_v12, %v231_v11  ;;  %v245_v22 = vld [vmem:[#allocation2 + $0x600] sm:$0xff] }
  0x49   :  { %1323 = vmatpush1.bf16.msra.mxu1 %v1322_v35  ;;  %1261 = vmatprep.subr.bf16.mxu0 %v1260_v36  ;;  %v1760_v16 = vld [vmem:[%s1816_s0 + $0x8] sm:$0xff]  ;;  %v1276_v21 = vpack.c.bf16 %v254_v15, %v246_v14  ;;  %v253_v23 = vld [vmem:[#allocation2 + $0x640] sm:$0xff]  ;;  %v247_v24 = vld [vmem:[#allocation2 + $0x610] sm:$0xff]  ;;  %v1340_v25 = vpack.c.bf16 %v256_v18, %v248_v17 }
  0x4a   :  { %1325 = vmatprep.subr.bf16.mxu1 %v1324_v40  ;;  %415 = vmatprep.mubr.f32.mxu0 %v1760_v16  ;;  %v255_v26 = vld [vmem:[#allocation2 + $0x650] sm:$0xff]  ;;  %v262_v27 = vld [vmem:[#allocation2 + $0x688] sm:$0xff]  ;;  %v264_v29 = vld [vmem:[#allocation2 + $0x698] sm:$0xff]  ;;  %v1278_v31 = vpack.c.bf16 %v253_v23, %v245_v22 }
  0x4b   :  { %486 = vmatprep.mubr.f32.mxu1 %v1760_v16  ;;  %v270_v28 = vld [vmem:[#allocation2 + $0x6c8] sm:$0xff]  ;;  %v272_v30 = vld [vmem:[#allocation2 + $0x6d8] sm:$0xff]  ;;  %v1342_v32 = vpack.c.bf16 %v255_v26, %v247_v24  ;;  %v261_v34 = vld [vmem:[#allocation2 + $0x680] sm:$0xff] }
  0x4c   :  { %1263 = vmatpush1.bf16.msra.mxu0 %v1262_v46  ;;  %v1280_v33 = vpack.c.bf16 %v270_v28, %v262_v27  ;;  %v269_v35 = vld [vmem:[#allocation2 + $0x6c0] sm:$0xff]  ;;  %v263_v36 = vld [vmem:[#allocation2 + $0x690] sm:$0xff]  ;;  %v1344_v37 = vpack.c.bf16 %v272_v30, %v264_v29  ;;  %v278_v39 = vld [vmem:[#allocation2 + $0x708] sm:$0xff] }
  0x4d   :  { %1327 = vmatpush1.bf16.msra.mxu1 %v1326_v47  ;;  %1265 = vmatprep.subr.bf16.mxu0 %v1264_v48  ;;  %v271_v38 = vld [vmem:[#allocation2 + $0x6d0] sm:$0xff]  ;;  %v286_v40 = vld [vmem:[#allocation2 + $0x748] sm:$0xff]  ;;  %v280_v41 = vld [vmem:[#allocation2 + $0x718] sm:$0xff]  ;;  %v1282_v43 = vpack.c.bf16 %v269_v35, %v261_v34 }
  0x4e   :  { %1329 = vmatprep.subr.bf16.mxu1 %v1328_v52  ;;  %v288_v42 = vld [vmem:[#allocation2 + $0x758] sm:$0xff]  ;;  %v1346_v44 = vpack.c.bf16 %v271_v38, %v263_v36  ;;  %v1284_v45 = vpack.c.bf16 %v286_v40, %v278_v39  ;;  %v277_v46 = vld [vmem:[#allocation2 + $0x700] sm:$0xff]  ;;  %v279_v48 = vld [vmem:[#allocation2 + $0x710] sm:$0xff] }
  0x4f   :  { %v285_v47 = vld [vmem:[#allocation2 + $0x740] sm:$0xff]  ;;  %v1348_v49 = vpack.c.bf16 %v288_v42, %v280_v41  ;;  %v287_v50 = vld [vmem:[#allocation2 + $0x750] sm:$0xff]  ;;  %v294_v51 = vld [vmem:[#allocation2 + $0x788] sm:$0xff] }
  0x50   :  { %1267 = vmatpush1.bf16.msra.mxu0 %v1266_v58  ;;  %v302_v52 = vld [vmem:[#allocation2 + $0x7c8] sm:$0xff]  ;;  %v296_v53 = vld [vmem:[#allocation2 + $0x798] sm:$0xff]  ;;  %v1286_v55 = vpack.c.bf16 %v285_v47, %v277_v46  ;;  %v1350_v56 = vpack.c.bf16 %v287_v50, %v279_v48  ;;  %v293_v58 = vld [vmem:[#allocation2 + $0x780] sm:$0xff] }
  0x51   :  { %1331 = vmatpush1.bf16.msra.mxu1 %v1330_v59  ;;  %1269 = vmatprep.subr.bf16.mxu0 %v1268_v60  ;;  %v304_v54 = vld [vmem:[#allocation2 + $0x7d8] sm:$0xff]  ;;  %v1288_v57 = vpack.c.bf16 %v302_v52, %v294_v51  ;;  %v301_v59 = vld [vmem:[#allocation2 + $0x7c0] sm:$0xff]  ;;  %v295_v60 = vld [vmem:[#allocation2 + $0x790] sm:$0xff] }
  0x52   :  { %1333 = vmatprep.subr.bf16.mxu1 %v1332_v0  ;;  %v1352_v61 = vpack.c.bf16 %v304_v54, %v296_v53  ;;  %v303_v62 = vld [vmem:[#allocation2 + $0x7d0] sm:$0xff]  ;;  %v58_v63 = vld [vmem:[#allocation2 + $0x28] sm:$0xff]  ;;  %v60_v1 = vld [vmem:[#allocation2 + $0x38] sm:$0xff]  ;;  %v1290_v3 = vpack.c.bf16 %v301_v59, %v293_v58 }
  0x53   :  { %v66_v0 = vld [vmem:[#allocation2 + $0x68] sm:$0xff]  ;;  %v68_v2 = vld [vmem:[#allocation2 + $0x78] sm:$0xff]  ;;  %v1354_v4 = vpack.c.bf16 %v303_v62, %v295_v60  ;;  %v65_v7 = vld [vmem:[#allocation2 + $0x60] sm:$0xff] }
  0x54   :  { %1271 = vmatpush1.bf16.msra.mxu0 %v1270_v6  ;;  %v1356_v5 = vpack.c.bf16 %v66_v0, %v58_v63  ;;  %v57_v6 = vld [vmem:[#allocation2 + $0x20] sm:$0xff]  ;;  %v67_v10 = vld [vmem:[#allocation2 + $0x70] sm:$0xff]  ;;  %v74_v11 = vld [vmem:[#allocation2 + $0xa8] sm:$0xff] }
  0x55   :  { %1335 = vmatpush1.bf16.msra.mxu1 %v1334_v8  ;;  %1273 = vmatprep.subr.bf16.mxu0 %v1272_v9  ;;  %v59_v8 = vld [vmem:[#allocation2 + $0x30] sm:$0xff]  ;;  %v1420_v9 = vpack.c.bf16 %v68_v2, %v60_v1  ;;  %v82_v12 = vld [vmem:[#allocation2 + $0xe8] sm:$0xff]  ;;  %v84_v14 = vld [vmem:[#allocation2 + $0xf8] sm:$0xff]  ;;  %v1358_v17 = vpack.c.bf16 %v65_v7, %v57_v6 }
  0x56   :  { %1337 = vmatprep.subr.bf16.mxu1 %v1336_v13  ;;  %v76_v13 = vld [vmem:[#allocation2 + $0xb8] sm:$0xff]  ;;  %v1767_v15 = vld [vmem:[%s1816_s0] sm:$0xff]  ;;  %v1422_v18 = vpack.c.bf16 %v67_v10, %v59_v8  ;;  %v75_v22 = vld [vmem:[#allocation2 + $0xb0] sm:$0xff] }
  0x57   :  { %v1424_v23 = vpack.c.bf16 %v84_v14, %v76_v13  ;;  %v83_v24 = vld [vmem:[#allocation2 + $0xf0] sm:$0xff]  ;;  %v98_v26 = vld [vmem:[#allocation2 + $0x168] sm:$0xff]  ;;  %v92_v27 = vld [vmem:[#allocation2 + $0x138] sm:$0xff] }
  0x58   :  { %1275 = vmatpush1.bf16.msra.mxu0 %v1274_v19  ;;  %v1360_v19 = vpack.c.bf16 %v82_v12, %v74_v11  ;;  %v100_v28 = vld [vmem:[#allocation2 + $0x178] sm:$0xff]  ;;  %v1426_v30 = vpack.c.bf16 %v83_v24, %v75_v22  ;;  %v91_v34 = vld [vmem:[#allocation2 + $0x130] sm:$0xff]  ;;  %v114_v38 = vld [vmem:[#allocation2 + $0x1e8] sm:$0xff] }
  0x59   :  { %1339 = vmatpush1.bf16.msra.mxu1 %v1338_v20  ;;  %1277 = vmatprep.subr.bf16.mxu0 %v1276_v21  ;;  %v73_v20 = vld [vmem:[#allocation2 + $0xa0] sm:$0xff]  ;;  %v1428_v35 = vpack.c.bf16 %v100_v28, %v92_v27  ;;  %v99_v36 = vld [vmem:[#allocation2 + $0x170] sm:$0xff]  ;;  %v108_v39 = vld [vmem:[#allocation2 + $0x1b8] sm:$0xff] }
  0x5a   :  { %1341 = vmatprep.subr.bf16.mxu1 %v1340_v25  ;;  %v81_v21 = vld [vmem:[#allocation2 + $0xe0] sm:$0xff]  ;;  %v90_v25 = vld [vmem:[#allocation2 + $0x128] sm:$0xff]  ;;  %v116_v40 = vld [vmem:[#allocation2 + $0x1f8] sm:$0xff]  ;;  %v1430_v42 = vpack.c.bf16 %v99_v36, %v91_v34 }
  0x5b   :  { %v1362_v29 = vpack.c.bf16 %v81_v21, %v73_v20  ;;  %v107_v46 = vld [vmem:[#allocation2 + $0x1b0] sm:$0xff]  ;;  %v1432_v47 = vpack.c.bf16 %v116_v40, %v108_v39  ;;  %v130_v50 = vld [vmem:[#allocation2 + $0x268] sm:$0xff]  ;;  %v124_v51 = vld [vmem:[#allocation2 + $0x238] sm:$0xff] }
  0x5c   :  { %1279 = vmatpush1.bf16.msra.mxu0 %v1278_v31  ;;  %v1364_v31 = vpack.c.bf16 %v98_v26, %v90_v25  ;;  %v115_v48 = vld [vmem:[#allocation2 + $0x1f0] sm:$0xff]  ;;  %v132_v52 = vld [vmem:[#allocation2 + $0x278] sm:$0xff]  ;;  %v138_v60 = vld [vmem:[#allocation2 + $0x2a8] sm:$0xff] }
  0x5d   :  { %1343 = vmatpush1.bf16.msra.mxu1 %v1342_v32  ;;  %1281 = vmatprep.subr.bf16.mxu0 %v1280_v33  ;;  %v89_v32 = vld [vmem:[#allocation2 + $0x120] sm:$0xff]  ;;  %v1436_v58 = vpack.c.bf16 %v132_v52, %v124_v51  ;;  %v131_v59 = vld [vmem:[#allocation2 + $0x270] sm:$0xff]  ;;  %v140_v62 = vld [vmem:[#allocation2 + $0x2b8] sm:$0xff] }
  0x5e   :  { %1345 = vmatprep.subr.bf16.mxu1 %v1344_v37  ;;  %v97_v33 = vld [vmem:[#allocation2 + $0x160] sm:$0xff]  ;;  %v106_v37 = vld [vmem:[#allocation2 + $0x1a8] sm:$0xff]  ;;  %v148_v63 = vld [vmem:[#allocation2 + $0x2f8] sm:$0xff] }
  0x5f   :  { %v1366_v41 = vpack.c.bf16 %v97_v33, %v89_v32  ;;  %v1440_v6 = vpack.c.bf16 %v148_v63, %v140_v62  ;;  %v147_v7 = vld [vmem:[#allocation2 + $0x2f0] sm:$0xff]  ;;  %v154_v8 = vld [vmem:[#allocation2 + $0x328] sm:$0xff]  ;;  %v156_v10 = vld [vmem:[#allocation2 + $0x338] sm:$0xff] }
  0x60   :  { %1283 = vmatpush1.bf16.msra.mxu0 %v1282_v43  ;;  %v1368_v43 = vpack.c.bf16 %v114_v38, %v106_v37  ;;  %v164_v11 = vld [vmem:[#allocation2 + $0x378] sm:$0xff]  ;;  %v163_v21 = vld [vmem:[#allocation2 + $0x370] sm:$0xff]  ;;  %v170_v22 = vld [vmem:[#allocation2 + $0x3a8] sm:$0xff] }
  0x61   :  { %1347 = vmatpush1.bf16.msra.mxu1 %v1346_v44  ;;  %1285 = vmatprep.subr.bf16.mxu0 %v1284_v45  ;;  %v105_v44 = vld [vmem:[#allocation2 + $0x1a0] sm:$0xff]  ;;  %v1444_v20 = vpack.c.bf16 %v164_v11, %v156_v10  ;;  %v172_v24 = vld [vmem:[#allocation2 + $0x3b8] sm:$0xff]  ;;  %v179_v33 = vld [vmem:[#allocation2 + $0x3f0] sm:$0xff] }
  0x62   :  { %1349 = vmatprep.subr.bf16.mxu1 %v1348_v49  ;;  %v113_v45 = vld [vmem:[#allocation2 + $0x1e0] sm:$0xff]  ;;  %v122_v49 = vld [vmem:[#allocation2 + $0x228] sm:$0xff]  ;;  %v180_v25 = vld [vmem:[#allocation2 + $0x3f8] sm:$0xff] }
  0x63   :  { %v1370_v53 = vpack.c.bf16 %v113_v45, %v105_v44  ;;  %v1372_v54 = vpack.c.bf16 %v130_v50, %v122_v49  ;;  %v1448_v32 = vpack.c.bf16 %v180_v25, %v172_v24  ;;  %v186_v34 = vld [vmem:[#allocation2 + $0x428] sm:$0xff]  ;;  %v188_v36 = vld [vmem:[#allocation2 + $0x438] sm:$0xff]  ;;  %v195_v45 = vld [vmem:[#allocation2 + $0x470] sm:$0xff] }
  0x64   :  { %1287 = vmatpush1.bf16.msra.mxu0 %v1286_v55  ;;  %v121_v55 = vld [vmem:[#allocation2 + $0x220] sm:$0xff]  ;;  %v196_v37 = vld [vmem:[#allocation2 + $0x478] sm:$0xff] }
  0x65   :  { %1351 = vmatpush1.bf16.msra.mxu1 %v1350_v56  ;;  %1289 = vmatprep.subr.bf16.mxu0 %v1288_v57  ;;  %v129_v56 = vld [vmem:[#allocation2 + $0x260] sm:$0xff]  ;;  %v123_v57 = vld [vmem:[#allocation2 + $0x230] sm:$0xff]  ;;  %v1452_v44 = vpack.c.bf16 %v196_v37, %v188_v36  ;;  %v212_v49 = vld [vmem:[#allocation2 + $0x4f8] sm:$0xff] }
  0x66   :  { %1353 = vmatprep.subr.bf16.mxu1 %v1352_v61  ;;  %v146_v61 = vld [vmem:[#allocation2 + $0x2e8] sm:$0xff]  ;;  %v1374_v0 = vpack.c.bf16 %v129_v56, %v121_v55  ;;  %v1438_v1 = vpack.c.bf16 %v131_v59, %v123_v57  ;;  %v211_v56 = vld [vmem:[#allocation2 + $0x4f0] sm:$0xff]  ;;  %v220_v59 = vld [vmem:[#allocation2 + $0x538] sm:$0xff] }
  0x67   :  { %v1376_v2 = vpack.c.bf16 %v146_v61, %v138_v60  ;;  %v218_v57 = vld [vmem:[#allocation2 + $0x528] sm:$0xff]  ;;  %v228_v60 = vld [vmem:[#allocation2 + $0x578] sm:$0xff] }
  0x68   :  { %1291 = vmatpush1.bf16.msra.mxu0 %v1290_v3  ;;  %v137_v3 = vld [vmem:[#allocation2 + $0x2a0] sm:$0xff] }
  0x69   :  { %1355 = vmatpush1.bf16.msra.mxu1 %v1354_v4  ;;  %1357 = vmatprep.subr.bf16.mxu0 %v1356_v5  ;;  %v145_v4 = vld [vmem:[#allocation2 + $0x2e0] sm:$0xff]  ;;  %v139_v5 = vld [vmem:[#allocation2 + $0x2b0] sm:$0xff] }
  0x6a   :  { %1421 = vmatprep.subr.bf16.mxu1 %v1420_v9  ;;  %v162_v9 = vld [vmem:[#allocation2 + $0x368] sm:$0xff]  ;;  %v1378_v12 = vpack.c.bf16 %v145_v4, %v137_v3  ;;  %v1442_v13 = vpack.c.bf16 %v147_v7, %v139_v5  ;;  %v1460_v3 = vpack.c.bf16 %v228_v60, %v220_v59  ;;  %v227_v4 = vld [vmem:[#allocation2 + $0x570] sm:$0xff]  ;;  %v236_v7 = vld [vmem:[#allocation2 + $0x5b8] sm:$0xff] }
  0x6b   :  { %416 = vmatmul.mubr.f32.vlgmr.msra.gmra.mrb[0].mxu0 %v1767_v15  ;;  %v1380_v14 = vpack.c.bf16 %v162_v9, %v154_v8  ;;  %v234_v5 = vld [vmem:[#allocation2 + $0x5a8] sm:$0xff]  ;;  %v244_v8 = vld [vmem:[#allocation2 + $0x5f8] sm:$0xff] }
  0x6c   :  { %487 = vmatmul.mubr.f32.vlgmr.msra.gmra.mrb[0].mxu1 %v1767_v15  ;;  %1359 = vmatpush1.bf16.msra.mxu0 %v1358_v17  ;;  %v153_v17 = vld [vmem:[#allocation2 + $0x320] sm:$0xff] }
  0x6d   :  { %1423 = vmatpush1.bf16.msra.mxu1 %v1422_v18  ;;  %1361 = vmatprep.subr.bf16.mxu0 %v1360_v19  ;;  %v161_v18 = vld [vmem:[#allocation2 + $0x360] sm:$0xff]  ;;  %v155_v19 = vld [vmem:[#allocation2 + $0x330] sm:$0xff] }
  0x6e   :  { %1425 = vmatprep.subr.bf16.mxu1 %v1424_v23  ;;  %557 = vmatprep.mubr.f32.mxu0 %v1760_v16  ;;  %v178_v23 = vld [vmem:[#allocation2 + $0x3e8] sm:$0xff]  ;;  %v1382_v26 = vpack.c.bf16 %v161_v18, %v153_v17  ;;  %v1446_v27 = vpack.c.bf16 %v163_v21, %v155_v19  ;;  %v1464_v17 = vpack.c.bf16 %v244_v8, %v236_v7  ;;  %v243_v18 = vld [vmem:[#allocation2 + $0x5f0] sm:$0xff]  ;;  %v252_v21 = vld [vmem:[#allocation2 + $0x638] sm:$0xff] }
  0x6f   :  { %628 = vmatprep.mubr.f32.mxu1 %v1760_v16  ;;  %v1434_v16 = vpack.c.bf16 %v115_v48, %v107_v46  ;;  %v1384_v28 = vpack.c.bf16 %v178_v23, %v170_v22  ;;  %v202_v46 = vld [vmem:[#allocation2 + $0x4a8] sm:$0xff]  ;;  %v204_v48 = vld [vmem:[#allocation2 + $0x4b8] sm:$0xff] }
  0x70   :  { %1363 = vmatpush1.bf16.msra.mxu0 %v1362_v29  ;;  %v169_v29 = vld [vmem:[#allocation2 + $0x3a0] sm:$0xff]  ;;  %v1456_v55 = vpack.c.bf16 %v212_v49, %v204_v48  ;;  %v250_v19 = vld [vmem:[#allocation2 + $0x628] sm:$0xff]  ;;  %v260_v22 = vld [vmem:[#allocation2 + $0x678] sm:$0xff] }
  0x71   :  { %1427 = vmatpush1.bf16.msra.mxu1 %v1426_v30  ;;  %1365 = vmatprep.subr.bf16.mxu0 %v1364_v31  ;;  %v177_v30 = vld [vmem:[#allocation2 + $0x3e0] sm:$0xff]  ;;  %v171_v31 = vld [vmem:[#allocation2 + $0x3b0] sm:$0xff] }
  0x72   :  { %1429 = vmatprep.subr.bf16.mxu1 %v1428_v35  ;;  %v194_v35 = vld [vmem:[#allocation2 + $0x468] sm:$0xff]  ;;  %v1386_v38 = vpack.c.bf16 %v177_v30, %v169_v29  ;;  %v1450_v39 = vpack.c.bf16 %v179_v33, %v171_v31  ;;  %v1468_v29 = vpack.c.bf16 %v260_v22, %v252_v21  ;;  %v259_v30 = vld [vmem:[#allocation2 + $0x670] sm:$0xff]  ;;  %v268_v33 = vld [vmem:[#allocation2 + $0x6b8] sm:$0xff] }
  0x73   :  { %v1388_v40 = vpack.c.bf16 %v194_v35, %v186_v34  ;;  %v266_v31 = vld [vmem:[#allocation2 + $0x6a8] sm:$0xff]  ;;  %v276_v34 = vld [vmem:[#allocation2 + $0x6f8] sm:$0xff] }
  0x74   :  { %1367 = vmatpush1.bf16.msra.mxu0 %v1366_v41  ;;  %v185_v41 = vld [vmem:[#allocation2 + $0x420] sm:$0xff] }
  0x75   :  { %1431 = vmatpush1.bf16.msra.mxu1 %v1430_v42  ;;  %1369 = vmatprep.subr.bf16.mxu0 %v1368_v43  ;;  %v193_v42 = vld [vmem:[#allocation2 + $0x460] sm:$0xff]  ;;  %v187_v43 = vld [vmem:[#allocation2 + $0x430] sm:$0xff] }
  0x76   :  { %1433 = vmatprep.subr.bf16.mxu1 %v1432_v47  ;;  %v210_v47 = vld [vmem:[#allocation2 + $0x4e8] sm:$0xff]  ;;  %v1390_v50 = vpack.c.bf16 %v193_v42, %v185_v41  ;;  %v1454_v51 = vpack.c.bf16 %v195_v45, %v187_v43  ;;  %v1472_v41 = vpack.c.bf16 %v276_v34, %v268_v33  ;;  %v275_v42 = vld [vmem:[#allocation2 + $0x6f0] sm:$0xff]  ;;  %v284_v45 = vld [vmem:[#allocation2 + $0x738] sm:$0xff] }
  0x77   :  { %v1392_v52 = vpack.c.bf16 %v210_v47, %v202_v46  ;;  %v282_v43 = vld [vmem:[#allocation2 + $0x728] sm:$0xff]  ;;  %v292_v46 = vld [vmem:[#allocation2 + $0x778] sm:$0xff] }
  0x78   :  { %1371 = vmatpush1.bf16.msra.mxu0 %v1370_v53  ;;  %v201_v53 = vld [vmem:[#allocation2 + $0x4a0] sm:$0xff] }
  0x79   :  { %1435 = vmatpush1.bf16.msra.mxu1 %v1434_v16  ;;  %1373 = vmatprep.subr.bf16.mxu0 %v1372_v54  ;;  %v209_v16 = vld [vmem:[#allocation2 + $0x4e0] sm:$0xff]  ;;  %v203_v54 = vld [vmem:[#allocation2 + $0x4b0] sm:$0xff] }
  0x7a   :  { %1437 = vmatprep.subr.bf16.mxu1 %v1436_v58  ;;  %v226_v58 = vld [vmem:[#allocation2 + $0x568] sm:$0xff]  ;;  %v1394_v61 = vpack.c.bf16 %v209_v16, %v201_v53  ;;  %v1458_v62 = vpack.c.bf16 %v211_v56, %v203_v54  ;;  %v1476_v53 = vpack.c.bf16 %v292_v46, %v284_v45  ;;  %v291_v16 = vld [vmem:[#allocation2 + $0x770] sm:$0xff]  ;;  %v300_v56 = vld [vmem:[#allocation2 + $0x7b8] sm:$0xff] }
  0x7b   :  { %v1396_v63 = vpack.c.bf16 %v226_v58, %v218_v57  ;;  %v298_v54 = vld [vmem:[#allocation2 + $0x7a8] sm:$0xff]  ;;  %v308_v57 = vld [vmem:[#allocation2 + $0x7f8] sm:$0xff]  ;;  %v657_v46 = vld [vmem:[#allocation5 + $0x30] sm:$0xff] }
  0x7c   :  { %1375 = vmatpush1.bf16.msra.mxu0 %v1374_v0  ;;  %v217_v0 = vld [vmem:[#allocation2 + $0x520] sm:$0xff] }
  0x7d   :  { %1439 = vmatpush1.bf16.msra.mxu1 %v1438_v1  ;;  %1377 = vmatprep.subr.bf16.mxu0 %v1376_v2  ;;  %v225_v1 = vld [vmem:[#allocation2 + $0x560] sm:$0xff]  ;;  %v219_v2 = vld [vmem:[#allocation2 + $0x530] sm:$0xff] }
  0x7e   :  { %1441 = vmatprep.subr.bf16.mxu1 %v1440_v6  ;;  %v242_v6 = vld [vmem:[#allocation2 + $0x5e8] sm:$0xff]  ;;  %v1398_v9 = vpack.c.bf16 %v225_v1, %v217_v0  ;;  %v1462_v10 = vpack.c.bf16 %v227_v4, %v219_v2  ;;  %v1480_v0 = vpack.c.bf16 %v308_v57, %v300_v56  ;;  %v307_v1 = vld [vmem:[#allocation2 + $0x7f0] sm:$0xff]  ;;  %v667_v2 = vld [vmem:[#allocation5 + $0x80] sm:$0xff] }
  0x7f   :  { %v1400_v11 = vpack.c.bf16 %v242_v6, %v234_v5  ;;  %v699_v4 = vld [vmem:[#allocation5 + $0x180] sm:$0xff]  ;;  %v700_v5 = vld [vmem:[#allocation5 + $0x188] sm:$0xff] }
  0x80   :  { %1379 = vmatpush1.bf16.msra.mxu0 %v1378_v12  ;;  %v233_v12 = vld [vmem:[#allocation2 + $0x5a0] sm:$0xff] }
  0x81   :  { %1443 = vmatpush1.bf16.msra.mxu1 %v1442_v13  ;;  %1381 = vmatprep.subr.bf16.mxu0 %v1380_v14  ;;  %v241_v13 = vld [vmem:[#allocation2 + $0x5e0] sm:$0xff]  ;;  %v235_v14 = vld [vmem:[#allocation2 + $0x5b0] sm:$0xff] }
  0x82   :  { %1445 = vmatprep.subr.bf16.mxu1 %v1444_v20  ;;  %v258_v20 = vld [vmem:[#allocation2 + $0x668] sm:$0xff]  ;;  %v1402_v23 = vpack.c.bf16 %v241_v13, %v233_v12  ;;  %v1466_v24 = vpack.c.bf16 %v243_v18, %v235_v14  ;;  %v1516_v12 = vpack.c.bf16 %v700_v5, %v699_v4  ;;  %v669_v14 = vld [vmem:[#allocation5 + $0x90] sm:$0xff]  ;;  %v659_v57 = vld [vmem:[#allocation5 + $0x40] sm:$0xff] }
  0x83   :  { %v1404_v25 = vpack.c.bf16 %v258_v20, %v250_v19  ;;  %v684_v13 = vld [vmem:[#allocation5 + $0x108] sm:$0xff]  ;;  %v701_v18 = vld [vmem:[#allocation5 + $0x190] sm:$0xff]  ;;  %v702_v19 = vld [vmem:[#allocation5 + $0x198] sm:$0xff] }
  0x84   :  { %1383 = vmatpush1.bf16.msra.mxu0 %v1382_v26  ;;  %v249_v26 = vld [vmem:[#allocation2 + $0x620] sm:$0xff]  ;;  %v661_v5 = vld [vmem:[#allocation5 + $0x50] sm:$0xff] }
  0x85   :  { %1447 = vmatpush1.bf16.msra.mxu1 %v1446_v27  ;;  %1385 = vmatprep.subr.bf16.mxu0 %v1384_v28  ;;  %v257_v27 = vld [vmem:[#allocation2 + $0x660] sm:$0xff]  ;;  %v251_v28 = vld [vmem:[#allocation2 + $0x630] sm:$0xff] }
  0x86   :  { %1449 = vmatprep.subr.bf16.mxu1 %v1448_v32  ;;  %v274_v32 = vld [vmem:[#allocation2 + $0x6e8] sm:$0xff]  ;;  %v1406_v35 = vpack.c.bf16 %v257_v27, %v249_v26  ;;  %v1470_v36 = vpack.c.bf16 %v259_v30, %v251_v28  ;;  %v1520_v26 = vpack.c.bf16 %v702_v19, %v701_v18  ;;  %v686_v27 = vld [vmem:[#allocation5 + $0x118] sm:$0xff]  ;;  %v671_v28 = vld [vmem:[#allocation5 + $0xa0] sm:$0xff] }
  0x87   :  { %v1408_v37 = vpack.c.bf16 %v274_v32, %v266_v31  ;;  %v703_v30 = vld [vmem:[#allocation5 + $0x1a0] sm:$0xff]  ;;  %v704_v31 = vld [vmem:[#allocation5 + $0x1a8] sm:$0xff] }
  0x88   :  { %1387 = vmatpush1.bf16.msra.mxu0 %v1386_v38  ;;  %v265_v38 = vld [vmem:[#allocation2 + $0x6a0] sm:$0xff] }
  0x89   :  { %1451 = vmatpush1.bf16.msra.mxu1 %v1450_v39  ;;  %1389 = vmatprep.subr.bf16.mxu0 %v1388_v40  ;;  %v273_v39 = vld [vmem:[#allocation2 + $0x6e0] sm:$0xff]  ;;  %v267_v40 = vld [vmem:[#allocation2 + $0x6b0] sm:$0xff] }
  0x8a   :  { %1453 = vmatprep.subr.bf16.mxu1 %v1452_v44  ;;  %v290_v44 = vld [vmem:[#allocation2 + $0x768] sm:$0xff]  ;;  %v1410_v47 = vpack.c.bf16 %v273_v39, %v265_v38  ;;  %v1474_v48 = vpack.c.bf16 %v275_v42, %v267_v40  ;;  %v1524_v38 = vpack.c.bf16 %v704_v31, %v703_v30  ;;  %v673_v40 = vld [vmem:[#allocation5 + $0xb0] sm:$0xff]  ;;  %v663_v19 = vld [vmem:[#allocation5 + $0x60] sm:$0xff] }
  0x8b   :  { %v1412_v49 = vpack.c.bf16 %v290_v44, %v282_v43  ;;  %v688_v39 = vld [vmem:[#allocation5 + $0x128] sm:$0xff]  ;;  %v705_v42 = vld [vmem:[#allocation5 + $0x1b0] sm:$0xff]  ;;  %v706_v43 = vld [vmem:[#allocation5 + $0x1b8] sm:$0xff] }
  0x8c   :  { %1391 = vmatpush1.bf16.msra.mxu0 %v1390_v50  ;;  %v281_v50 = vld [vmem:[#allocation2 + $0x720] sm:$0xff]  ;;  %v665_v31 = vld [vmem:[#allocation5 + $0x70] sm:$0xff] }
  0x8d   :  { %1455 = vmatpush1.bf16.msra.mxu1 %v1454_v51  ;;  %1393 = vmatprep.subr.bf16.mxu0 %v1392_v52  ;;  %v289_v51 = vld [vmem:[#allocation2 + $0x760] sm:$0xff]  ;;  %v283_v52 = vld [vmem:[#allocation2 + $0x730] sm:$0xff] }
  0x8e   :  { %1457 = vmatprep.subr.bf16.mxu1 %v1456_v55  ;;  %v306_v55 = vld [vmem:[#allocation2 + $0x7e8] sm:$0xff]  ;;  %v1414_v58 = vpack.c.bf16 %v289_v51, %v281_v50  ;;  %v1478_v59 = vpack.c.bf16 %v291_v16, %v283_v52  ;;  %v690_v50 = vld [vmem:[#allocation5 + $0x138] sm:$0xff]  ;;  %v675_v51 = vld [vmem:[#allocation5 + $0xc0] sm:$0xff] }
  0x8f   :  { %v1416_v60 = vpack.c.bf16 %v306_v55, %v298_v54  ;;  %v676_v52 = vld [vmem:[#allocation5 + $0xc8] sm:$0xff] }
  0x90   :  { %1395 = vmatpush1.bf16.msra.mxu0 %v1394_v61  ;;  %v297_v61 = vld [vmem:[#allocation2 + $0x7a0] sm:$0xff]  ;;  %v708_v16 = vld [vmem:[#allocation5 + $0x1c8] sm:$0xff]  ;;  %v1500_v56 = vpack.c.bf16 %v676_v52, %v675_v51 }
  0x91   :  { %1459 = vmatpush1.bf16.msra.mxu1 %v1458_v62  ;;  %1397 = vmatprep.subr.bf16.mxu0 %v1396_v63  ;;  %v305_v62 = vld [vmem:[#allocation2 + $0x7e0] sm:$0xff]  ;;  %v299_v63 = vld [vmem:[#allocation2 + $0x7b0] sm:$0xff] }
  0x92   :  { %1461 = vmatprep.subr.bf16.mxu1 %v1460_v3  ;;  %v668_v3 = vld [vmem:[#allocation5 + $0x88] sm:$0xff]  ;;  %v1418_v6 = vpack.c.bf16 %v305_v62, %v297_v61  ;;  %v1482_v7 = vpack.c.bf16 %v307_v1, %v299_v63  ;;  %v677_v62 = vld [vmem:[#allocation5 + $0xd0] sm:$0xff]  ;;  %v678_v63 = vld [vmem:[#allocation5 + $0xd8] sm:$0xff] }
  0x93   :  { %v1484_v8 = vpack.c.bf16 %v668_v3, %v667_v2  ;;  %v692_v61 = vld [vmem:[#allocation5 + $0x148] sm:$0xff]  ;;  %v710_v1 = vld [vmem:[#allocation5 + $0x1d8] sm:$0xff]  ;;  %v1504_v4 = vpack.c.bf16 %v678_v63, %v677_v62 }
  0x94   :  { %1399 = vmatpush1.bf16.msra.mxu0 %v1398_v9  ;;  %v651_v9 = vld [vmem:[#allocation5] sm:$0xff]  ;;  %v748_v63 = vld [vmem:[#allocation5 + $0x308] sm:$0xff] }
  0x95   :  { %1463 = vmatpush1.bf16.msra.mxu1 %v1462_v10  ;;  %1401 = vmatprep.subr.bf16.mxu0 %v1400_v11  ;;  %v652_v10 = vld [vmem:[#allocation5 + $0x8] sm:$0xff]  ;;  %v683_v11 = vld [vmem:[#allocation5 + $0x100] sm:$0xff] }
  0x96   :  { %1465 = vmatprep.subr.bf16.mxu1 %v1464_v17  ;;  %v670_v17 = vld [vmem:[#allocation5 + $0x98] sm:$0xff]  ;;  %v1486_v20 = vpack.c.bf16 %v652_v10, %v651_v9  ;;  %v1518_v21 = vpack.c.bf16 %v684_v13, %v683_v11  ;;  %v679_v10 = vld [vmem:[#allocation5 + $0xe0] sm:$0xff]  ;;  %v680_v11 = vld [vmem:[#allocation5 + $0xe8] sm:$0xff] }
  0x97   :  { %v1488_v22 = vpack.c.bf16 %v670_v17, %v669_v14  ;;  %v694_v9 = vld [vmem:[#allocation5 + $0x158] sm:$0xff]  ;;  %v712_v13 = vld [vmem:[#allocation5 + $0x1e8] sm:$0xff]  ;;  %v1508_v18 = vpack.c.bf16 %v680_v11, %v679_v10 }
  0x98   :  { %1403 = vmatpush1.bf16.msra.mxu0 %v1402_v23  ;;  %v653_v23 = vld [vmem:[#allocation5 + $0x10] sm:$0xff] }
  0x99   :  { %1467 = vmatpush1.bf16.msra.mxu1 %v1466_v24  ;;  %1405 = vmatprep.subr.bf16.mxu0 %v1404_v25  ;;  %v654_v24 = vld [vmem:[#allocation5 + $0x18] sm:$0xff]  ;;  %v685_v25 = vld [vmem:[#allocation5 + $0x110] sm:$0xff] }
  0x9a   :  { %1469 = vmatprep.subr.bf16.mxu1 %v1468_v29  ;;  %v672_v29 = vld [vmem:[#allocation5 + $0xa8] sm:$0xff]  ;;  %v1490_v32 = vpack.c.bf16 %v654_v24, %v653_v23  ;;  %v1522_v33 = vpack.c.bf16 %v686_v27, %v685_v25  ;;  %v681_v24 = vld [vmem:[#allocation5 + $0xf0] sm:$0xff]  ;;  %v682_v25 = vld [vmem:[#allocation5 + $0xf8] sm:$0xff] }
  0x9b   :  { %v1492_v34 = vpack.c.bf16 %v672_v29, %v671_v28  ;;  %v696_v23 = vld [vmem:[#allocation5 + $0x168] sm:$0xff]  ;;  %v714_v28 = vld [vmem:[#allocation5 + $0x1f8] sm:$0xff]  ;;  %v1512_v30 = vpack.c.bf16 %v682_v25, %v681_v24 }
  0x9c   :  { %1407 = vmatpush1.bf16.msra.mxu0 %v1406_v35  ;;  %v655_v35 = vld [vmem:[#allocation5 + $0x20] sm:$0xff] }
  0x9d   :  { %1471 = vmatpush1.bf16.msra.mxu1 %v1470_v36  ;;  %1409 = vmatprep.subr.bf16.mxu0 %v1408_v37  ;;  %v656_v36 = vld [vmem:[#allocation5 + $0x28] sm:$0xff]  ;;  %v687_v37 = vld [vmem:[#allocation5 + $0x120] sm:$0xff] }
  0x9e   :  { %1473 = vmatprep.subr.bf16.mxu1 %v1472_v41  ;;  %v674_v41 = vld [vmem:[#allocation5 + $0xb8] sm:$0xff]  ;;  %v1494_v44 = vpack.c.bf16 %v656_v36, %v655_v35 }
  0x9f   :  { %v1496_v45 = vpack.c.bf16 %v674_v41, %v673_v40  ;;  %v698_v35 = vld [vmem:[#allocation5 + $0x178] sm:$0xff]  ;;  %v763_v40 = vld [vmem:[#allocation5 + $0x380] sm:$0xff] }
  0xa0   :  { %1411 = vmatpush1.bf16.msra.mxu0 %v1410_v47  ;;  %v658_v47 = vld [vmem:[#allocation5 + $0x38] sm:$0xff] }
  0xa1   :  { %1475 = vmatpush1.bf16.msra.mxu1 %v1474_v48  ;;  %1413 = vmatprep.subr.bf16.mxu0 %v1412_v49  ;;  %v689_v48 = vld [vmem:[#allocation5 + $0x130] sm:$0xff]  ;;  %v1528_v49 = vpack.c.bf16 %v706_v43, %v705_v42  ;;  %v1498_v54 = vpack.c.bf16 %v658_v47, %v657_v46  ;;  %v764_v42 = vld [vmem:[#allocation5 + $0x388] sm:$0xff]  ;;  %v1781_v46 = vld [vmem:[%s1818_s2] sm:$0xff]  ;;  %s1697_s2 = smov [#allocation7]  }
  0xa2   :  { %1477 = vmatprep.subr.bf16.mxu1 %v1476_v53  ;;  %v707_v53 = vld [vmem:[#allocation5 + $0x1c0] sm:$0xff]  ;;  %v1530_v55 = vpack.c.bf16 %v690_v50, %v689_v48  ;;  %v1580_v43 = vpack.c.bf16 %v764_v42, %v763_v40  ;;  %v753_v40 = vld [vmem:[#allocation5 + $0x330] sm:$0xff]  ;;  %v754_v42 = vld [vmem:[#allocation5 + $0x338] sm:$0xff]  ;;  %s1073_s28 = sshll.u32 %s1697_s2, 4  ;;  %s1074_s28 = int_to_ptr.vmem [resolvable:$true] %s1073_s28 }
  0xa3   :  { %s1663_s29 = scalar_lea.vmem %s1074_s28, 1024  ;;  %p1668_p3 = scmp.lt.s32.totalorder %s1074_s28, %s1074_s28 }
  0xa4   :  { %1415 = vmatpush1.bf16.msra.mxu0 %v1414_v58  ;;  %v660_v58 = vld [vmem:[#allocation5 + $0x48] sm:$0xff]  ;;  %p1664_p2 = scmp.ne.s32.totalorder %s1074_s28, %s1663_s29  ;;  %p1669_p4 = scmp.lt.s32.totalorder %s1663_s29, %s1663_s29 }
  0xa5   :  { %1479 = vmatpush1.bf16.msra.mxu1 %v1478_v59  ;;  %1417 = vmatprep.subr.bf16.mxu0 %v1416_v60  ;;  %v691_v59 = vld [vmem:[#allocation5 + $0x140] sm:$0xff]  ;;  %v1532_v60 = vpack.c.bf16 %v708_v16, %v707_v53  ;;  %v1502_v2 = vpack.c.bf16 %v660_v58, %v659_v57  ;;  %v716_v58 = vld [vmem:[#allocation5 + $0x208] sm:$0xff] }
  0xa6   :  { %1481 = vmatprep.subr.bf16.mxu1 %v1480_v0  ;;  %v709_v0 = vld [vmem:[#allocation5 + $0x1d0] sm:$0xff]  ;;  %v1534_v3 = vpack.c.bf16 %v692_v61, %v691_v59  ;;  %v715_v57 = vld [vmem:[#allocation5 + $0x200] sm:$0xff]  ;;  %p1670_p5 = por %p1669_p4, %p1668_p3 }
  0xa7   :  { %v747_v59 = vld [vmem:[#allocation5 + $0x300] sm:$0xff] }
  0xa8   :  { %1419 = vmatpush1.bf16.msra.mxu0 %v1418_v6  ;;  %v662_v6 = vld [vmem:[#allocation5 + $0x58] sm:$0xff]  ;;  %v1582_v10 = vpack.c.bf16 %v748_v63, %v747_v59  ;;  %p1671_p6 = pnand %p1670_p5, %p1664_p2 }
  0xa9   :  { %1483 = vmatpush1.bf16.msra.mxu1 %v1482_v7  ;;  %1485 = vmatprep.subr.bf16.mxu0 %v1484_v8  ;;  %v693_v7 = vld [vmem:[#allocation5 + $0x150] sm:$0xff]  ;;  %v1536_v8 = vpack.c.bf16 %v710_v1, %v709_v0  ;;  %v1506_v14 = vpack.c.bf16 %v662_v6, %v661_v5  ;;  %v734_v1 = vld [vmem:[#allocation5 + $0x298] sm:$0xff] }
  0xaa   :  { %1517 = vmatprep.subr.bf16.mxu1 %v1516_v12  ;;  %v711_v12 = vld [vmem:[#allocation5 + $0x1e0] sm:$0xff]  ;;  %v1538_v17 = vpack.c.bf16 %v694_v9, %v693_v7  ;;  %v733_v0 = vld [vmem:[#allocation5 + $0x290] sm:$0xff]  ;;  %v766_v5 = vld [vmem:[#allocation5 + $0x398] sm:$0xff] }
  0xab   :  { %558 = vmatmul.mubr.f32.vlgmr.msra.gmra.mrb[2].mxu0 %v1767_v15  ;;  %v1552_v11 = vpack.c.bf16 %v734_v1, %v733_v0  ;;  %v726_v63 = vld [vmem:[#allocation5 + $0x258] sm:$0xff]  ;;  %v757_v0 = vld [vmem:[#allocation5 + $0x350] sm:$0xff] }
  0xac   :  { %629 = vmatmul.mubr.f32.vlgmr.msra.gmra.mrb[2].mxu1 %v1767_v15  ;;  %1487 = vmatpush3.bf16.msra.mxu0 %v1486_v20  ;;  %v1526_v15 = vpack.c.bf16 %v688_v39, %v687_v37  ;;  %v664_v20 = vld [vmem:[#allocation5 + $0x68] sm:$0xff] }
  0xad   :  { %1519 = vmatpush3.bf16.msra.mxu1 %v1518_v21  ;;  %1489 = vmatprep.subr.bf16.mxu0 %v1488_v22  ;;  %v1540_v21 = vpack.c.bf16 %v712_v13, %v711_v12  ;;  %v695_v22 = vld [vmem:[#allocation5 + $0x160] sm:$0xff]  ;;  %v1510_v27 = vpack.c.bf16 %v664_v20, %v663_v19  ;;  %v732_v39 = vld [vmem:[#allocation5 + $0x288] sm:$0xff]  ;;  %v717_v12 = vld [vmem:[#allocation5 + $0x210] sm:$0xff] }
  0xae   :  { %1521 = vmatprep.subr.bf16.mxu1 %v1520_v26  ;;  %v713_v26 = vld [vmem:[#allocation5 + $0x1f0] sm:$0xff]  ;;  %v1542_v29 = vpack.c.bf16 %v696_v23, %v695_v22  ;;  %v718_v13 = vld [vmem:[#allocation5 + $0x218] sm:$0xff]  ;;  %v735_v19 = vld [vmem:[#allocation5 + $0x2a0] sm:$0xff] }
  0xaf   :  { %v736_v20 = vld [vmem:[#allocation5 + $0x2a8] sm:$0xff]  ;;  %v1554_v23 = vpack.c.bf16 %v718_v13, %v717_v12  ;;  %v759_v12 = vld [vmem:[#allocation5 + $0x360] sm:$0xff] }
  0xb0   :  { %1491 = vmatpush3.bf16.msra.mxu0 %v1490_v32  ;;  %v666_v32 = vld [vmem:[#allocation5 + $0x78] sm:$0xff]  ;;  %v768_v22 = vld [vmem:[#allocation5 + $0x3a8] sm:$0xff]  ;;  %v1556_v25 = vpack.c.bf16 %v736_v20, %v735_v19  ;;  %v777_v19 = vld [vmem:[#allocation5 + $0x3f0] sm:$0xff] }
  0xb1   :  { %1523 = vmatpush3.bf16.msra.mxu1 %v1522_v33  ;;  %1493 = vmatprep.subr.bf16.mxu0 %v1492_v34  ;;  %v1544_v33 = vpack.c.bf16 %v714_v28, %v713_v26  ;;  %v697_v34 = vld [vmem:[#allocation5 + $0x170] sm:$0xff]  ;;  %v1514_v36 = vpack.c.bf16 %v666_v32, %v665_v31  ;;  %v719_v26 = vld [vmem:[#allocation5 + $0x220] sm:$0xff]  ;;  %v738_v32 = vld [vmem:[#allocation5 + $0x2b8] sm:$0xff] }
  0xb2   :  { %1525 = vmatprep.subr.bf16.mxu1 %v1524_v38  ;;  %v1546_v37 = vpack.c.bf16 %v698_v35, %v697_v34  ;;  %v731_v38 = vld [vmem:[#allocation5 + $0x280] sm:$0xff]  ;;  %v737_v31 = vld [vmem:[#allocation5 + $0x2b0] sm:$0xff]  ;;  %v770_v34 = vld [vmem:[#allocation5 + $0x3b8] sm:$0xff] }
  0xb3   :  { %v1548_v41 = vpack.c.bf16 %v732_v39, %v731_v38  ;;  %v751_v28 = vld [vmem:[#allocation5 + $0x320] sm:$0xff]  ;;  %v721_v38 = vld [vmem:[#allocation5 + $0x230] sm:$0xff]  ;;  %v722_v39 = vld [vmem:[#allocation5 + $0x238] sm:$0xff] }
  0xb4   :  { %1495 = vmatpush3.bf16.msra.mxu0 %v1494_v44  ;;  %v311_v44 = vlaneseq  ;;  %v778_v20 = vld [vmem:[#allocation5 + $0x3f8] sm:$0xff] }
  0xb5   :  { %1527 = vmatpush3.bf16.msra.mxu1 %v1526_v15  ;;  %1497 = vmatprep.subr.bf16.mxu0 %v1496_v45 }
  0xb6   :  { %1529 = vmatprep.subr.bf16.mxu1 %v1528_v49  ;;  %v1775_v15 = vshrl.u32 %v311_v44, 7  ;;  %v740_v44 = vld [vmem:[#allocation5 + $0x2c8] sm:$0xff] }
  0xb8   :  { %1499 = vmatpush3.bf16.msra.mxu0 %v1498_v54  ;;  %v313_v45 = vsub.s32 0, %v1775_v15  ;;  %v321_v47 = vsub.s32 2, %v1775_v15  ;;  %v317_v48 = vsub.s32 1, %v1775_v15  ;;  %v325_v49 = vsub.s32 3, %v1775_v15 }
  0xb9   :  { %1531 = vmatpush3.bf16.msra.mxu1 %v1530_v55  ;;  %1501 = vmatprep.subr.bf16.mxu0 %v1500_v56 }
  0xba   :  { %1533 = vmatprep.subr.bf16.mxu1 %v1532_v60  ;;  %v314_v50 = vrot.slane %v1781_v46, %v313_v45  ;;  %v322_v51 = vrot.slane %v1781_v46, %v321_v47  ;;  %v318_v52 = vrot.slane %v1781_v46, %v317_v48  ;;  %v326_v53 = vrot.slane %v1781_v46, %v325_v49  ;;  %v771_v45 = vld [vmem:[#allocation5 + $0x3c0] sm:$0xff]  ;;  %v772_v47 = vld [vmem:[#allocation5 + $0x3c8] sm:$0xff] }
  0xbb   :  { %v1562_v48 = vpack.c.bf16 %v722_v39, %v721_v38  ;;  %v1594_v49 = vpack.c.bf16 %v754_v42, %v753_v40 }
  0xbc   :  { %1503 = vmatpush3.bf16.msra.mxu0 %v1502_v2 }
  0xbd   :  { %1535 = vmatpush3.bf16.msra.mxu1 %v1534_v3  ;;  %1505 = vmatprep.subr.bf16.mxu0 %v1504_v4  ;;  %v765_v4 = vld [vmem:[#allocation5 + $0x390] sm:$0xff] }
  0xbe   :  { %1537 = vmatprep.subr.bf16.mxu1 %v1536_v8  ;;  %v1550_v8 = vpack.c.bf16 %v716_v58, %v715_v57  ;;  %v773_v57 = vld [vmem:[#allocation5 + $0x3d0] sm:$0xff]  ;;  %v774_v58 = vld [vmem:[#allocation5 + $0x3d8] sm:$0xff] }
  0xbf   :  { %v1600_v1 = vpack.c.bf16 %v774_v58, %v773_v57 }
  0xc0   :  { %1507 = vmatpush3.bf16.msra.mxu0 %v1506_v14  ;;  %v749_v14 = vld [vmem:[#allocation5 + $0x310] sm:$0xff] }
  0xc1   :  { %1539 = vmatpush3.bf16.msra.mxu1 %v1538_v17  ;;  %1509 = vmatprep.subr.bf16.mxu0 %v1508_v18  ;;  %v1584_v17 = vpack.c.bf16 %v766_v5, %v765_v4  ;;  %v750_v18 = vld [vmem:[#allocation5 + $0x318] sm:$0xff]  ;;  %v744_v4 = vld [vmem:[#allocation5 + $0x2e8] sm:$0xff]  ;;  %v775_v5 = vld [vmem:[#allocation5 + $0x3e0] sm:$0xff] }
  0xc2   :  { %1541 = vmatprep.subr.bf16.mxu1 %v1540_v21  ;;  %v767_v21 = vld [vmem:[#allocation5 + $0x3a0] sm:$0xff]  ;;  %v1586_v24 = vpack.c.bf16 %v750_v18, %v749_v14  ;;  %v760_v14 = vld [vmem:[#allocation5 + $0x368] sm:$0xff]  ;;  %v746_v18 = vld [vmem:[#allocation5 + $0x2f8] sm:$0xff] }
  0xc4   :  { %1511 = vmatpush3.bf16.msra.mxu0 %v1510_v27  ;;  %v720_v27 = vld [vmem:[#allocation5 + $0x228] sm:$0xff] }
  0xc5   :  { %1543 = vmatpush3.bf16.msra.mxu1 %v1542_v29  ;;  %1513 = vmatprep.subr.bf16.mxu0 %v1512_v30  ;;  %v1588_v29 = vpack.c.bf16 %v768_v22, %v767_v21  ;;  %v752_v30 = vld [vmem:[#allocation5 + $0x328] sm:$0xff]  ;;  %v1558_v35 = vpack.c.bf16 %v720_v27, %v719_v26  ;;  %v1606_v22 = vpack.c.bf16 %v760_v14, %v759_v12  ;;  %v761_v27 = vld [vmem:[#allocation5 + $0x370] sm:$0xff] }
  0xc6   :  { %1545 = vmatprep.subr.bf16.mxu1 %v1544_v33  ;;  %v769_v33 = vld [vmem:[#allocation5 + $0x3b0] sm:$0xff]  ;;  %v1608_v26 = vpack.c.bf16 %v778_v20, %v777_v19 }
  0xc8   :  { %1515 = vmatpush3.bf16.msra.mxu0 %v1514_v36  ;;  %v1590_v36 = vpack.c.bf16 %v752_v30, %v751_v28  ;;  %v762_v28 = vld [vmem:[#allocation5 + $0x378] sm:$0xff] }
  0xc9   :  { %1547 = vmatpush3.bf16.msra.mxu1 %v1546_v37  ;;  %1549 = vmatprep.subr.bf16.mxu0 %v1548_v41  ;;  %v1560_v37 = vpack.c.bf16 %v738_v32, %v737_v31  ;;  %v1592_v41 = vpack.c.bf16 %v770_v34, %v769_v33  ;;  %v1610_v30 = vpack.c.bf16 %v762_v28, %v761_v27  ;;  %v329_v31 = vsub.s32 4, %v1775_v15 }
  0xca   :  { %1581 = vmatprep.subr.bf16.mxu1 %v1580_v43  ;;  %v739_v43 = vld [vmem:[#allocation5 + $0x2c0] sm:$0xff]  ;;  %v337_v32 = vsub.s32 6, %v1775_v15  ;;  %v333_v33 = vsub.s32 5, %v1775_v15  ;;  %v341_v34 = vsub.s32 7, %v1775_v15 }
  0xcc   :  { %v342_v38 = vrot.slane %v1781_v46, %v341_v34 }
 0x13e   :  { %v417_v16 = vpop.f32.mrb[0].mxu0 }
 0x13f   :  { %v418_v54 = vadd.f32 %v417_v16, %v314_v50  ;;  %v488_v55 = vpop.f32.mrb[0].mxu1  ;;  %v419_v56 = vpop.f32.mrb[1].mxu0  ;;  %v1564_v50 = vpack.c.bf16 %v740_v44, %v739_v43  ;;  %v1596_v16 = vpack.c.bf16 %v772_v47, %v771_v45 }
 0x140   :  { %v489_v60 = vadd.f32 %v488_v55, %v322_v51  ;;  %v420_v61 = vadd.f32 %v419_v56, %v318_v52  ;;  %v490_v62 = vpop.f32.mrb[1].mxu1  ;;  %v723_v51 = vld [vmem:[#allocation5 + $0x240] sm:$0xff]  ;;  %v724_v52 = vld [vmem:[#allocation5 + $0x248] sm:$0xff]  ;;  %v741_v55 = vld [vmem:[#allocation5 + $0x2d0] sm:$0xff] }
 0x141   :  { %v635_v2 = vmax.f32 %v418_v54, 0.0  ;;  %v491_v3 = vadd.f32 %v490_v62, %v326_v53  ;;  %v755_v53 = vld [vmem:[#allocation5 + $0x340] sm:$0xff]  ;;  %v756_v54 = vld [vmem:[#allocation5 + $0x348] sm:$0xff]  ;;  %v742_v56 = vld [vmem:[#allocation5 + $0x2d8] sm:$0xff]  ;;  %v1566_v59 = vpack.c.bf16 %v724_v52, %v723_v51 }
 0x142   :  { %v637_v6 = vmax.f32 %v489_v60, 0.0  ;;  %v636_v7 = vmax.f32 %v420_v61, 0.0  ;;  %v1598_v60 = vpack.c.bf16 %v756_v54, %v755_v53  ;;  %v1568_v61 = vpack.c.bf16 %v742_v56, %v741_v55  ;;  %v725_v62 = vld [vmem:[#allocation5 + $0x250] sm:$0xff] }
 0x143   :  { %643 = vst [vmem:[#allocation7] sm:$0xff] %v635_v2  ;;  %v638_v9 = vmax.f32 %v491_v3, 0.0  ;;  %v743_v3 = vld [vmem:[#allocation5 + $0x2e0] sm:$0xff] }
 0x144   :  { %645 = vst [vmem:[#allocation7 + $0x10] sm:$0xff] %v637_v6  ;;  %644 = vst [vmem:[#allocation7 + $0x8] sm:$0xff] %v636_v7  ;;  %850 = vmatprep.mubr.f32.mxu0 %v636_v7  ;;  %v1570_v7 = vpack.c.bf16 %v726_v63, %v725_v62 }
 0x145   :  { %646 = vst [vmem:[#allocation7 + $0x18] sm:$0xff] %v638_v9  ;;  %920 = vmatprep.mubr.f32.mxu1 %v638_v9  ;;  %851 = vmatmul.mubr.f32.vlgmr.msra.gmra.mrb[4].mxu0 %v635_v2  ;;  %v758_v2 = vld [vmem:[#allocation5 + $0x358] sm:$0xff]  ;;  %v1572_v9 = vpack.c.bf16 %v744_v4, %v743_v3 }
 0x146   :  { %921 = vmatmul.mubr.f32.vlgmr.msra.gmra.mrb[4].mxu1 %v637_v6  ;;  %1551 = vmatpush3.bf16.msra.mxu0 %v1550_v8  ;;  %v776_v6 = vld [vmem:[#allocation5 + $0x3e8] sm:$0xff]  ;;  %v1602_v8 = vpack.c.bf16 %v758_v2, %v757_v0 }
 0x147   :  { %1583 = vmatpush3.bf16.msra.mxu1 %v1582_v10  ;;  %1553 = vmatprep.subr.bf16.mxu0 %v1552_v11  ;;  %v727_v10 = vld [vmem:[#allocation5 + $0x260] sm:$0xff]  ;;  %v728_v11 = vld [vmem:[#allocation5 + $0x268] sm:$0xff]  ;;  %v1604_v13 = vpack.c.bf16 %v776_v6, %v775_v5 }
 0x148   :  { %1585 = vmatprep.subr.bf16.mxu1 %v1584_v17  ;;  %v745_v17 = vld [vmem:[#allocation5 + $0x2f0] sm:$0xff]  ;;  %v1574_v21 = vpack.c.bf16 %v728_v11, %v727_v10 }
 0x14a   :  { %1555 = vmatpush3.bf16.msra.mxu0 %v1554_v23  ;;  %v1576_v23 = vpack.c.bf16 %v746_v18, %v745_v17 }
 0x14b   :  { %1587 = vmatpush3.bf16.msra.mxu1 %v1586_v24  ;;  %1557 = vmatprep.subr.bf16.mxu0 %v1556_v25  ;;  %v729_v24 = vld [vmem:[#allocation5 + $0x270] sm:$0xff]  ;;  %v730_v25 = vld [vmem:[#allocation5 + $0x278] sm:$0xff] }
 0x14c   :  { %1589 = vmatprep.subr.bf16.mxu1 %v1588_v29  ;;  %v1578_v29 = vpack.c.bf16 %v730_v25, %v729_v24 }
 0x14e   :  { %1559 = vmatpush3.bf16.msra.mxu0 %v1558_v35  ;;  %v330_v35 = vrot.slane %v1781_v46, %v329_v31 }
 0x14f   :  { %1591 = vmatpush3.bf16.msra.mxu1 %v1590_v36  ;;  %1561 = vmatprep.subr.bf16.mxu0 %v1560_v37  ;;  %v338_v36 = vrot.slane %v1781_v46, %v337_v32  ;;  %v334_v37 = vrot.slane %v1781_v46, %v333_v33 }
 0x150   :  { %1593 = vmatprep.subr.bf16.mxu1 %v1592_v41 }
 0x152   :  { %1563 = vmatpush3.bf16.msra.mxu0 %v1562_v48 }
 0x153   :  { %1595 = vmatpush3.bf16.msra.mxu1 %v1594_v49  ;;  %1565 = vmatprep.subr.bf16.mxu0 %v1564_v50 }
 0x154   :  { %1597 = vmatprep.subr.bf16.mxu1 %v1596_v16 }
 0x156   :  { %1567 = vmatpush3.bf16.msra.mxu0 %v1566_v59 }
 0x157   :  { %1599 = vmatpush3.bf16.msra.mxu1 %v1598_v60  ;;  %1569 = vmatprep.subr.bf16.mxu0 %v1568_v61 }
 0x158   :  { %1601 = vmatprep.subr.bf16.mxu1 %v1600_v1 }
 0x15a   :  { %1571 = vmatpush3.bf16.msra.mxu0 %v1570_v7 }
 0x15b   :  { %1603 = vmatpush3.bf16.msra.mxu1 %v1602_v8  ;;  %1573 = vmatprep.subr.bf16.mxu0 %v1572_v9 }
 0x15c   :  { %1605 = vmatprep.subr.bf16.mxu1 %v1604_v13 }
 0x15e   :  { %1575 = vmatpush3.bf16.msra.mxu0 %v1574_v21 }
 0x15f   :  { %1607 = vmatpush3.bf16.msra.mxu1 %v1606_v22  ;;  %1577 = vmatprep.subr.bf16.mxu0 %v1576_v23 }
 0x160   :  { %1609 = vmatprep.subr.bf16.mxu1 %v1608_v26 }
 0x162   :  { %1579 = vmatpush3.bf16.msra.mxu0 %v1578_v29 }
 0x163   :  { %1611 = vmatpush3.bf16.msra.mxu1 %v1610_v30 }
 0x17e   :  { %v559_v39 = vpop.f32.mrb[2].mxu0 }
 0x17f   :  { %v560_v40 = vadd.f32 %v559_v39, %v330_v35  ;;  %v630_v41 = vpop.f32.mrb[2].mxu1  ;;  %v561_v42 = vpop.f32.mrb[3].mxu0 }
 0x180   :  { %v631_v43 = vadd.f32 %v630_v41, %v338_v36  ;;  %v562_v44 = vadd.f32 %v561_v42, %v334_v37  ;;  %v632_v45 = vpop.f32.mrb[3].mxu1 }
 0x181   :  { %v639_v47 = vmax.f32 %v560_v40, 0.0  ;;  %v633_v48 = vadd.f32 %v632_v45, %v342_v38 }
 0x182   :  { %v641_v49 = vmax.f32 %v631_v43, 0.0  ;;  %v640_v50 = vmax.f32 %v562_v44, 0.0 }
 0x183   :  { %647 = vst [vmem:[#allocation7 + $0x20] sm:$0xff] %v639_v47  ;;  %v642_v15 = vmax.f32 %v633_v48, 0.0 }
 0x184   :  { %649 = vst [vmem:[#allocation7 + $0x30] sm:$0xff] %v641_v49  ;;  %648 = vst [vmem:[#allocation7 + $0x28] sm:$0xff] %v640_v50  ;;  %990 = vmatprep.mubr.f32.mxu0 %v640_v50 }
 0x185   :  { %650 = vst [vmem:[#allocation7 + $0x38] sm:$0xff] %v642_v15  ;;  %1060 = vmatprep.mubr.f32.mxu1 %v642_v15  ;;  %991 = vmatmul.mubr.f32.vlgmr.msra.gmra.mrb[6].mxu0 %v639_v47 }
 0x186   :  { %1061 = vmatmul.mubr.f32.vlgmr.msra.gmra.mrb[6].mxu1 %v641_v49 }
 0x187   :  { %1674 = shalt.err (!%p1671_p6)
}
 0x188   :  { %s1675_s8 = scalar_lea.hbm %s1821_s5, 1024 }
 0x189   :  { %p1676_p7 = scmp.ne.s32.totalorder %s1821_s5, %s1675_s8  ;;  %p1679_p8 = scmp.lt.u32.totalorder %s1675_s8, %s1821_s5 }
 0x18b   :  { %p1681_p9 = pnand %p1679_p8, %p1676_p7 }
 0x18d   :  { %1684 = shalt.err (!%p1681_p9)
}
 0x18e   :  { %1076 = dma.vmem_to_hbm [thread:$0]  %s1074_s28, 1024, %s1821_s5, [#allocation4]   ;;  %v1087_v52 = vld [vmem:[%s1820_s4] ss:$0 sm:$0xff] }
 0x218   :  { %v1120_v46 = vpop.f32.mrb[4].mxu0 }
 0x219   :  { %v1155_v51 = vpop.f32.mrb[4].mxu1  ;;  %v1121_v53 = vpop.f32.mrb[5].mxu0 }
 0x21a   :  { %v1122_v16 = vadd.f32 %v1121_v53, %v1120_v46  ;;  %v1156_v54 = vpop.f32.mrb[5].mxu1 }
 0x21b   :  { %v1157_v55 = vadd.f32 %v1156_v54, %v1155_v51 }
 0x21c   :  { %v853_v56 = vadd.f32 %v1122_v16, %v1087_v52 }
 0x21e   :  { %v923_v57 = vadd.f32 %v1157_v55, %v853_v56 }
 0x258   :  { %v1190_v58 = vpop.f32.mrb[6].mxu0 }
 0x259   :  { %v1225_v59 = vpop.f32.mrb[6].mxu1  ;;  %v1191_v60 = vpop.f32.mrb[7].mxu0 }
 0x25a   :  { %v1192_v61 = vadd.f32 %v1191_v60, %v1190_v58  ;;  %v1226_v62 = vpop.f32.mrb[7].mxu1 }
 0x25b   :  { %v1227_v63 = vadd.f32 %v1226_v62, %v1225_v59 }
 0x25c   :  { %v993_v0 = vadd.f32 %v1192_v61, %v923_v57 }
 0x25e   :  { %v1063_v1 = vadd.f32 %v1227_v63, %v993_v0 }
 0x260   :  { %1066 = vst [vmem:[%s1822_s6] sm:$0xff] %v1063_v1 }
 0x261   :  { %1689 = dma.done.wait [#allocation4], 1024  }
 0x262   :  { %1690 = vsyncadd [#allocation4], 4294966272 }
 0x263   :  { %1084 = vsyncpa [#allocation3], 1 }
 0x264   :  { %1085 = vsyncpa [#allocation6], 1 }
 0x265   :  { %1086 = vsyncpa [#allocation4], 1 }

</bundles_post_ra>
